<compile_context>
chip_gen: v7x
topology: tpu7x:2x2x1
jax: 0.10.0
libtpu: 0.0.40
codegen_flags: <defaults>
</compile_context>

<pallas_src>
import jax
import jax.numpy as jnp
from jax import lax
from jax.experimental import pallas as pl
from jax.experimental.pallas import tpu as pltpu


def _mlp_kernel(x_ref, w1_ref, b1_ref, w2_ref, b2_ref,
                w3_ref, b3_ref, w4t_ref, b4_ref, o_ref):
    # Layer 1: (tile_b, d_in) bf16 @ (d_in, 256) bf16 -> f32 acc, +bias, ReLU.
    h = jnp.dot(x_ref[...], w1_ref[...], preferred_element_type=jnp.float32)
    h = jnp.maximum(h + b1_ref[...], 0.0)
    # Layer 2
    h = jnp.dot(h.astype(jnp.bfloat16), w2_ref[...],
                preferred_element_type=jnp.float32)
    h = jnp.maximum(h + b2_ref[...], 0.0)
    # Layer 3
    h = jnp.dot(h.astype(jnp.bfloat16), w3_ref[...],
                preferred_element_type=jnp.float32)
    h = jnp.maximum(h + b3_ref[...], 0.0)
    # Output head: (1, 64) contracted with (tile_b, 64) on the last axis
    # (q @ k^T pattern) -> lane-dense (1, tile_b) result, unmasked store.
    out = lax.dot_general(w4t_ref[...], h.astype(jnp.bfloat16),
                          (((1,), (1,)), ((), ())),
                          preferred_element_type=jnp.float32)
    o_ref[...] = out + b4_ref[...]


def gq_head_forward(x, params, *, tile_b=512):
    """Runs the GQEstimator.gq_head MLP. x: (B, D_in) f32 -> (B,) f32."""
    (w1, b1), (w2, b2), (w3, b3), (w4, b4) = params
    B, d_in = x.shape

    num_tiles = pl.cdiv(B, tile_b)
    b_pad = num_tiles * tile_b
    if b_pad != B:
        x = jnp.pad(x, ((0, b_pad - B), (0, 0)))

    # bf16 on the MXU operands (x + weights); f32 accumulation / biases.
    xb = x.astype(jnp.bfloat16)
    w1b = w1.astype(jnp.bfloat16)
    w2b = w2.astype(jnp.bfloat16)
    w3b = w3.astype(jnp.bfloat16)
    w4t = w4.T.astype(jnp.bfloat16)                  # (1, 64)
    b1f = b1.astype(jnp.float32)
    b2f = b2.astype(jnp.float32)
    b3f = b3.astype(jnp.float32)
    b4f = b4.reshape(1, 1).astype(jnp.float32)       # scalar bias as (1, 1)

    # Resident (constant-block-index) specs: DMA'd once, stay in VMEM.
    def _resident(a):
        nd = a.ndim
        return pl.BlockSpec(a.shape, lambda i, _n=nd: (0,) * _n)

    mac = d_in * 256 + 256 * 128 + 128 * 64 + 64 * 1
    cost = pl.CostEstimate(
        flops=2 * b_pad * mac,
        transcendentals=0,
        bytes_accessed=(b_pad * d_in * 2          # bf16 x stream
                        + 2 * mac                 # bf16 weights (once)
                        + 4 * (256 + 128 + 64 + 1)  # f32 biases
                        + 4 * b_pad))             # f32 output

    out = pl.pallas_call(
        _mlp_kernel,
        out_shape=jax.ShapeDtypeStruct((1, b_pad), jnp.float32),
        grid_spec=pltpu.PrefetchScalarGridSpec(
            num_scalar_prefetch=0,
            grid=(num_tiles,),
            in_specs=[
                pl.BlockSpec((tile_b, d_in), lambda i: (i, 0)),   # x tile
                _resident(w1b), _resident(b1f),
                _resident(w2b), _resident(b2f),
                _resident(w3b), _resident(b3f),
                _resident(w4t), _resident(b4f),
            ],
            out_specs=pl.BlockSpec((1, tile_b), lambda i: (0, i)),
        ),
        compiler_params=pltpu.CompilerParams(
            dimension_semantics=("parallel",)),
        cost_estimate=cost,
    )(xb, w1b, b1f, w2b, b2f, w3b, b3f, w4t, b4f)

    return out[0, :B]   # == grasp_quality.view(-1)


def init_params(key, d_in, fc_dims=(256, 128, 64)):
    """Deterministic synthetic params for gq_head (Linear as (in,out) + bias)."""
    dims = [d_in, *fc_dims, 1]
    params = []
    for li in range(len(dims) - 1):
        k_w, k_b, key = jax.random.split(key, 3)
        fan_in, fan_out = dims[li], dims[li + 1]
        scale = 1.0 / jnp.sqrt(jnp.float32(fan_in))
        w = jax.random.uniform(k_w, (fan_in, fan_out), jnp.float32,
                               minval=-scale, maxval=scale)
        b = jax.random.uniform(k_b, (1, fan_out), jnp.float32,
                               minval=-scale, maxval=scale)
        params.append((w, b))
    return params


def reference_forward(x, params):
    """f32 reference computed from the same bf16-quantized x / weights."""
    (w1, b1), (w2, b2), (w3, b3), (w4, b4) = params

    def q(a):  # bf16 round-trip, math in f32
        return a.astype(jnp.bfloat16).astype(jnp.float32)

    h = q(x)
    h = jnp.maximum(h @ q(w1) + b1, 0.0)
    h = jnp.maximum(q(h) @ q(w2) + b2, 0.0)
    h = jnp.maximum(q(h) @ q(w3) + b3, 0.0)
    h = q(h) @ q(w4) + b4
    return h.reshape(-1)


if __name__ == "__main__":
    # Small config consistent with the module: input_size=16 ->
    # conv_output_size = 16 // 16 = 1, flattened_size = 1*1*1*(16*8) = 128,
    # so D_in = flattened_size + 19 = 147.
    base_channels = 16
    input_size = 16
    conv_output_size = input_size // 16
    flattened_size = conv_output_size ** 3 * (base_channels * 8)
    d_in = flattened_size + 19        # 147

    key = jax.random.PRNGKey(0)
    k_x1, k_x2, k_p = jax.random.split(key, 3)
    params = init_params(k_p, d_in)

    # Case 1: tiny batch (exercises pad-to-tile + single grid step).
    B1 = 8
    x1 = jax.random.normal(k_x1, (B1, d_in), jnp.float32)
    out1 = jax.block_until_ready(gq_head_forward(x1, params))
    ref1 = reference_forward(x1, params)
    assert out1.shape == (B1,)
    assert jnp.allclose(out1, ref1, atol=2e-3, rtol=2e-3), (out1, ref1)

    # Case 2: B not a tile multiple, multiple grid steps (tile_b=128).
    B2 = 300
    x2 = jax.random.normal(k_x2, (B2, d_in), jnp.float32)
    out2 = jax.block_until_ready(gq_head_forward(x2, params, tile_b=128))
    ref2 = reference_forward(x2, params)
    assert out2.shape == (B2,)
    assert jnp.allclose(out2, ref2, atol=2e-3, rtol=2e-3), (out2, ref2)

    # TODO(synk): encode_sdf's Conv3d/MaxPool3d stack is not exercised by
    # forward(), so it is intentionally not implemented here.
    print("KERNEL_OK")
</pallas_src>

<mosaic_0001>
module attributes {stable_mosaic.version = 11 : i64} {
  func.func @_mlp_kernel(%arg0: i32, %arg1: memref<512x147xbf16, #tpu.memory_space<vmem>>, %arg2: memref<147x256xbf16, #tpu.memory_space<vmem>>, %arg3: memref<1x256xf32, #tpu.memory_space<vmem>>, %arg4: memref<256x128xbf16, #tpu.memory_space<vmem>>, %arg5: memref<1x128xf32, #tpu.memory_space<vmem>>, %arg6: memref<128x64xbf16, #tpu.memory_space<vmem>>, %arg7: memref<1x64xf32, #tpu.memory_space<vmem>>, %arg8: memref<1x64xbf16, #tpu.memory_space<vmem>>, %arg9: memref<1x1xf32, #tpu.memory_space<vmem>>, %arg10: memref<1x512xf32, #tpu.memory_space<vmem>>) attributes {dimension_semantics = [#tpu.dimension_semantics<parallel>], iteration_bounds = array<i64: 1>, scalar_prefetch = 0 : i64, scratch_operands = 0 : i64, tpu.core_type = #tpu.core_type<tc>, window_params = [{transform_indices = @transform_0, window_bounds = array<i64: 512, 147>}, {pipeline_mode = #tpu.pipeline_mode<synchronous>, transform_indices = @transform_1, window_bounds = array<i64: 147, 256>}, {pipeline_mode = #tpu.pipeline_mode<synchronous>, transform_indices = @transform_2, window_bounds = array<i64: 1, 256>}, {pipeline_mode = #tpu.pipeline_mode<synchronous>, transform_indices = @transform_3, window_bounds = array<i64: 256, 128>}, {pipeline_mode = #tpu.pipeline_mode<synchronous>, transform_indices = @transform_4, window_bounds = array<i64: 1, 128>}, {pipeline_mode = #tpu.pipeline_mode<synchronous>, transform_indices = @transform_5, window_bounds = array<i64: 128, 64>}, {pipeline_mode = #tpu.pipeline_mode<synchronous>, transform_indices = @transform_6, window_bounds = array<i64: 1, 64>}, {pipeline_mode = #tpu.pipeline_mode<synchronous>, transform_indices = @transform_7, window_bounds = array<i64: 1, 64>}, {pipeline_mode = #tpu.pipeline_mode<synchronous>, transform_indices = @transform_8, window_bounds = array<i64: 1, 1>}, {transform_indices = @transform_9, window_bounds = array<i64: 1, 512>}]} {
    %c0 = arith.constant 0 : index
    %c0_0 = arith.constant 0 : index
    %0 = vector.load %arg1[%c0, %c0_0] : memref<512x147xbf16, #tpu.memory_space<vmem>>, vector<512x147xbf16>
    %c0_1 = arith.constant 0 : index
    %c0_2 = arith.constant 0 : index
    %1 = vector.load %arg2[%c0_1, %c0_2] : memref<147x256xbf16, #tpu.memory_space<vmem>>, vector<147x256xbf16>
    %cst = arith.constant dense<0.000000e+00> : vector<512x256xf32>
    %2 = tpu.matmul %0, %1, %cst {dimension_numbers = #tpu.dot_dimension_numbers<[1], [0], [0], [1], [0, 0, 1, 1], [], []>} : vector<512x147xbf16>, vector<147x256xbf16>, vector<512x256xf32> -> vector<512x256xf32>
    %c0_3 = arith.constant 0 : index
    %c0_4 = arith.constant 0 : index
    %3 = vector.load %arg3[%c0_3, %c0_4] : memref<1x256xf32, #tpu.memory_space<vmem>>, vector<1x256xf32>
    %4 = vector.broadcast %3 : vector<1x256xf32> to vector<512x256xf32>
    %5 = arith.addf %2, %4 : vector<512x256xf32>
    %cst_5 = arith.constant 0.000000e+00 : f32
    %6 = vector.broadcast %cst_5 : f32 to vector<512x256xf32>
    %7 = arith.maximumf %5, %6 : vector<512x256xf32>
    %8 = arith.truncf %7 : vector<512x256xf32> to vector<512x256xbf16>
    %c0_6 = arith.constant 0 : index
    %c0_7 = arith.constant 0 : index
    %9 = vector.load %arg4[%c0_6, %c0_7] : memref<256x128xbf16, #tpu.memory_space<vmem>>, vector<256x128xbf16>
    %cst_8 = arith.constant dense<0.000000e+00> : vector<512x128xf32>
    %10 = tpu.matmul %8, %9, %cst_8 {dimension_numbers = #tpu.dot_dimension_numbers<[1], [0], [0], [1], [0, 0, 1, 1], [], []>} : vector<512x256xbf16>, vector<256x128xbf16>, vector<512x128xf32> -> vector<512x128xf32>
    %c0_9 = arith.constant 0 : index
    %c0_10 = arith.constant 0 : index
    %11 = vector.load %arg5[%c0_9, %c0_10] : memref<1x128xf32, #tpu.memory_space<vmem>>, vector<1x128xf32>
    %12 = vector.broadcast %11 : vector<1x128xf32> to vector<512x128xf32>
    %13 = arith.addf %10, %12 : vector<512x128xf32>
    %cst_11 = arith.constant 0.000000e+00 : f32
    %14 = vector.broadcast %cst_11 : f32 to vector<512x128xf32>
    %15 = arith.maximumf %13, %14 : vector<512x128xf32>
    %16 = arith.truncf %15 : vector<512x128xf32> to vector<512x128xbf16>
    %c0_12 = arith.constant 0 : index
    %c0_13 = arith.constant 0 : index
    %17 = vector.load %arg6[%c0_12, %c0_13] : memref<128x64xbf16, #tpu.memory_space<vmem>>, vector<128x64xbf16>
    %cst_14 = arith.constant dense<0.000000e+00> : vector<512x64xf32>
    %18 = tpu.matmul %16, %17, %cst_14 {dimension_numbers = #tpu.dot_dimension_numbers<[1], [0], [0], [1], [0, 0, 1, 1], [], []>} : vector<512x128xbf16>, vector<128x64xbf16>, vector<512x64xf32> -> vector<512x64xf32>
    %c0_15 = arith.constant 0 : index
    %c0_16 = arith.constant 0 : index
    %19 = vector.load %arg7[%c0_15, %c0_16] : memref<1x64xf32, #tpu.memory_space<vmem>>, vector<1x64xf32>
    %20 = vector.broadcast %19 : vector<1x64xf32> to vector<512x64xf32>
    %21 = arith.addf %18, %20 : vector<512x64xf32>
    %cst_17 = arith.constant 0.000000e+00 : f32
    %22 = vector.broadcast %cst_17 : f32 to vector<512x64xf32>
    %23 = arith.maximumf %21, %22 : vector<512x64xf32>
    %c0_18 = arith.constant 0 : index
    %c0_19 = arith.constant 0 : index
    %24 = vector.load %arg8[%c0_18, %c0_19] : memref<1x64xbf16, #tpu.memory_space<vmem>>, vector<1x64xbf16>
    %25 = arith.truncf %23 : vector<512x64xf32> to vector<512x64xbf16>
    %cst_20 = arith.constant dense<0.000000e+00> : vector<1x512xf32>
    %26 = tpu.matmul %24, %25, %cst_20 {dimension_numbers = #tpu.dot_dimension_numbers<[1], [1], [0], [0], [0, 0, 1, 0], [], []>} : vector<1x64xbf16>, vector<512x64xbf16>, vector<1x512xf32> -> vector<1x512xf32>
    %c0_21 = arith.constant 0 : index
    %c0_22 = arith.constant 0 : index
    %27 = vector.load %arg9[%c0_21, %c0_22] : memref<1x1xf32, #tpu.memory_space<vmem>>, vector<1x1xf32>
    %28 = vector.broadcast %27 : vector<1x1xf32> to vector<1x512xf32>
    %29 = arith.addf %26, %28 : vector<1x512xf32>
    %c0_23 = arith.constant 0 : index
    %c0_24 = arith.constant 0 : index
    %30 = vector.load %arg10[%c0_23, %c0_24] : memref<1x512xf32, #tpu.memory_space<vmem>>, vector<1x512xf32>
    tpu.vector_store %arg10[%c0_23, %c0_24], %29 {strides = array<i32>} : memref<1x512xf32, #tpu.memory_space<vmem>>, vector<1x512xf32>,
    return
  }
  func.func @transform_0(%arg0: i32) -> (i32, i32) {
    %c0_i32 = arith.constant 0 : i32
    %c0_i32_0 = arith.constant 0 : i32
    return %arg0, %c0_i32 : i32, i32
  }
  func.func @transform_1(%arg0: i32) -> (i32, i32) {
    %c0_i32 = arith.constant 0 : i32
    %c0_i32_0 = arith.constant 0 : i32
    %c0_i32_1 = arith.constant 0 : i32
    return %c0_i32, %c0_i32_0 : i32, i32
  }
  func.func @transform_2(%arg0: i32) -> (i32, i32) {
    %c0_i32 = arith.constant 0 : i32
    %c0_i32_0 = arith.constant 0 : i32
    %c0_i32_1 = arith.constant 0 : i32
    return %c0_i32, %c0_i32_0 : i32, i32
  }
  func.func @transform_3(%arg0: i32) -> (i32, i32) {
    %c0_i32 = arith.constant 0 : i32
    %c0_i32_0 = arith.constant 0 : i32
    %c0_i32_1 = arith.constant 0 : i32
    return %c0_i32, %c0_i32_0 : i32, i32
  }
  func.func @transform_4(%arg0: i32) -> (i32, i32) {
    %c0_i32 = arith.constant 0 : i32
    %c0_i32_0 = arith.constant 0 : i32
    %c0_i32_1 = arith.constant 0 : i32
    return %c0_i32, %c0_i32_0 : i32, i32
  }
  func.func @transform_5(%arg0: i32) -> (i32, i32) {
    %c0_i32 = arith.constant 0 : i32
    %c0_i32_0 = arith.constant 0 : i32
    %c0_i32_1 = arith.constant 0 : i32
    return %c0_i32, %c0_i32_0 : i32, i32
  }
  func.func @transform_6(%arg0: i32) -> (i32, i32) {
    %c0_i32 = arith.constant 0 : i32
    %c0_i32_0 = arith.constant 0 : i32
    %c0_i32_1 = arith.constant 0 : i32
    return %c0_i32, %c0_i32_0 : i32, i32
  }
  func.func @transform_7(%arg0: i32) -> (i32, i32) {
    %c0_i32 = arith.constant 0 : i32
    %c0_i32_0 = arith.constant 0 : i32
    %c0_i32_1 = arith.constant 0 : i32
    return %c0_i32, %c0_i32_0 : i32, i32
  }
  func.func @transform_8(%arg0: i32) -> (i32, i32) {
    %c0_i32 = arith.constant 0 : i32
    %c0_i32_0 = arith.constant 0 : i32
    %c0_i32_1 = arith.constant 0 : i32
    return %c0_i32, %c0_i32_0 : i32, i32
  }
  func.func @transform_9(%arg0: i32) -> (i32, i32) {
    %c0_i32 = arith.constant 0 : i32
    %c0_i32_0 = arith.constant 0 : i32
    return %c0_i32, %arg0 : i32, i32
  }
}

</mosaic_0001>

<bundles_post_ra>
// kernel: tpu_custom_call.1
= control target key start
LH: loop header
LB: loop body
LE: loop exit
PB: predicated region body
PF: predicated region fallthrough
CT: control target
= control target key end

     0   :  { %s3690_s0 = inlined_call_operand.vmem [shape: bf16[512,147], index: 0, kind: input, shape index: {}]   ;;  %s3691_s1 = inlined_call_operand.vmem [shape: bf16[147,256], index: 1, kind: input, shape index: {}]   ;;  %s3692_s2 = inlined_call_operand.vmem [shape: f32[1,256], index: 2, kind: input, shape index: {}]   ;;  %s3693_s3 = inlined_call_operand.vmem [shape: bf16[256,128], index: 3, kind: input, shape index: {}]   ;;  %s3694_s4 = inlined_call_operand.vmem [shape: f32[1,128], index: 4, kind: input, shape index: {}]   ;;  %s3695_s5 = inlined_call_operand.vmem [shape: bf16[128,64], index: 5, kind: input, shape index: {}]   ;;  %s3696_s6 = inlined_call_operand.vmem [shape: f32[1,64], index: 6, kind: input, shape index: {}]   ;;  %s3697_s7 = inlined_call_operand.vmem [shape: bf16[1,64], index: 7, kind: input, shape index: {}]   ;;  %s3698_s8 = inlined_call_operand.<no memory space> [shape: f32[1,1], index: 8, kind: input, shape index: {}]   ;;  %s3699_s9 = inlined_call_operand.hbm [shape: f32[1,512], index: 9, kind: output, shape index: {}]  }
   0x1   :  { %v14_v0 = vstv %s3698_s8 }
   0x2   :  { %15 = vst [vmem:[#allocation2] sm:$0x1] %v14_v0 }
   0x3   :  { %v2704_v1 = vld [vmem:[%s3691_s1 + $0x4] ss:$8 sps:$4 sm:$0xff]   ;;  %v2706_v2 = vld [vmem:[%s3691_s1] ss:$8 sps:$4 sm:$0xff]   ;;  %v2707_v3 = vld [vmem:[%s3691_s1 + $0x14] ss:$8 sps:$4 sm:$0xff]  }
   0x4   :  { %621 = vmatprep.subr.bf16.mxu0 %v2704_v1  ;;  %v2709_v4 = vld [vmem:[%s3691_s1 + $0x10] ss:$8 sps:$4 sm:$0xff]   ;;  %v2710_v5 = vld [vmem:[%s3691_s1 + $0x24] ss:$8 sps:$4 sm:$0xff]   ;;  %v2712_v6 = vld [vmem:[%s3691_s1 + $0x20] ss:$8 sps:$4 sm:$0xff]  }
   0x5   :  { %622 = vmatpush1.bf16.msra.mxu0 %v2706_v2  ;;  %v2713_v7 = vld [vmem:[%s3691_s1 + $0x34] ss:$8 sps:$4 sm:$0xff]   ;;  %v2715_v8 = vld [vmem:[%s3691_s1 + $0x30] ss:$8 sps:$4 sm:$0xff]   ;;  %v2716_v9 = vld [vmem:[%s3691_s1 + $0x44] ss:$8 sps:$4 sm:$0xff]  }
   0x6   :  { %623 = vmatprep.subr.bf16.mxu0 %v2707_v3  ;;  %vm514_vm0 = vcmask 154624   ;;  %v2735_v10 = vld [vmem:[%s3690_s0 + $0x4] ss:$8 sps:$4 sm:$0xff]   ;;  %v2718_v11 = vld [vmem:[%s3691_s1 + $0x40] ss:$8 sps:$4 sm:$0xff]   ;;  %vm611_vm1 = vcmask 1040384  }
   0x7   :  { %2467 = vmatprep.mubr.msk.bf16.mxu0 %vm514_vm0, %v2735_v10  ;;  %v2719_v12 = vld [vmem:[%s3691_s1 + $0x54] ss:$8 sps:$4 sm:$0xff]   ;;  %v2721_v13 = vld [vmem:[%s3691_s1 + $0x50] ss:$8 sps:$4 sm:$0xff]   ;;  %v2722_v14 = vld [vmem:[%s3691_s1 + $0x64] ss:$8 sps:$4 sm:$0xff]  }
   0x8   :  { %v2724_v15 = vld [vmem:[%s3691_s1 + $0x60] ss:$8 sps:$4 sm:$0xff]   ;;  %v2725_v16 = vld [vmem:[%s3691_s1 + $0x74] ss:$8 sps:$4 sm:$0xff]   ;;  %vm612_vm2 = vcmask 1041408   ;;  %v2877_v18 = vmov 65535  }
   0x9   :  { %624 = vmatpush1.bf16.msra.mxu0 %v2709_v4  ;;  %v118_v17 = vld [vmem:[%s3691_s1 + $0x90] sm:$0x33]  ;;  %v613_v19 = vsel %vm611_vm1, 4294967295, %v2877_v18  ;;  %v2728_v21 = vld [vmem:[%s3691_s1 + $0x84] ss:$8 sps:$4 sm:$0xff]   ;;  %v2878_v29 = vmov 0  }
   0xa   :  { %625 = vmatprep.subr.bf16.mxu0 %v2710_v5  ;;  %v2727_v20 = vld [vmem:[%s3691_s1 + $0x70] ss:$8 sps:$4 sm:$0xff]   ;;  %v2466_v22 = vcombine.high %v118_v17, %v118_v17  ;;  %v614_v23 = vsel %vm612_vm2, %v613_v19, 0  ;;  %v2730_v24 = vld [vmem:[%s3691_s1 + $0x80] ss:$8 sps:$4 sm:$0xff]   ;;  %v2465_v25 = vcombine.low %v118_v17, %v118_v17  ;;  %1301 = vmatprep.subr.bf16.mxu1 %v2878_v29 }
   0xb   :  { %v2781_v27 = vld [vmem:[%s3693_s3] sm:$0xff]   ;;  %v2782_v30 = vld [vmem:[%s3693_s3 + $0x8] sm:$0xff]   ;;  %2703 = vset.pattern.permute.xlu0 %v2878_v29  ;;  %v2736_v32 = vld [vmem:[%s3690_s0 + $0x14] ss:$8 sps:$4 sm:$0xff]  }
   0xc   :  { %v619_v26 = vand.u32 %v2466_v22, %v614_v23  ;;  %v616_v28 = vand.u32 %v2465_v25, %v614_v23  ;;  %1302 = vmatpush1.bf16.msra.mxu1 %v2781_v27  ;;  %v2733_v31 = vld [vmem:[%s3690_s0] ss:$8 sps:$4 sm:$0xff]   ;;  %v2783_v33 = vld [vmem:[%s3693_s3 + $0x10] sm:$0xff]   ;;  %v2784_v34 = vld [vmem:[%s3693_s3 + $0x18] sm:$0xff]  }
   0xd   :  { %626 = vmatpush1.bf16.msra.mxu0 %v2712_v6  ;;  %1303 = vmatprep.subr.bf16.mxu1 %v2878_v29  ;;  %v2738_v35 = vld [vmem:[%s3690_s0 + $0x10] ss:$8 sps:$4 sm:$0xff]   ;;  %v2739_v36 = vld [vmem:[%s3690_s0 + $0x24] ss:$8 sps:$4 sm:$0xff]   ;;  %v2741_v39 = vld [vmem:[%s3690_s0 + $0x20] ss:$8 sps:$4 sm:$0xff]  }
   0xe   :  { %627 = vmatprep.subr.bf16.mxu0 %v2713_v7  ;;  %v2788_v37 = vld [vmem:[%s3693_s3 + $0x20] sm:$0xff]   ;;  %v2789_v38 = vld [vmem:[%s3693_s3 + $0x28] sm:$0xff]   ;;  %v2742_v40 = vld [vmem:[%s3690_s0 + $0x34] ss:$8 sps:$4 sm:$0xff]  }
   0xf   :  { %v2793_v41 = vld [vmem:[%s3693_s3 + $0x30] sm:$0xff]   ;;  %v2794_v42 = vld [vmem:[%s3693_s3 + $0x38] sm:$0xff]   ;;  %v2745_v44 = vld [vmem:[%s3690_s0 + $0x44] ss:$8 sps:$4 sm:$0xff]  }
  0x10   :  { %1304 = vmatpush1.bf16.msra.mxu1 %v2782_v30  ;;  %v2744_v43 = vld [vmem:[%s3690_s0 + $0x30] ss:$8 sps:$4 sm:$0xff]   ;;  %v2798_v45 = vld [vmem:[%s3693_s3 + $0x40] sm:$0xff]  }
  0x11   :  { %628 = vmatpush1.bf16.msra.mxu0 %v2715_v8  ;;  %1305 = vmatprep.subr.bf16.mxu1 %v2878_v29 }
  0x12   :  { %629 = vmatprep.subr.bf16.mxu0 %v2716_v9 }
  0x14   :  { %1306 = vmatpush1.bf16.msra.mxu1 %v2783_v33 }
  0x15   :  { %630 = vmatpush1.bf16.msra.mxu0 %v2718_v11  ;;  %1307 = vmatprep.subr.bf16.mxu1 %v2878_v29 }
  0x16   :  { %631 = vmatprep.subr.bf16.mxu0 %v2719_v12 }
  0x18   :  { %1308 = vmatpush1.bf16.msra.mxu1 %v2784_v34 }
  0x19   :  { %632 = vmatpush1.bf16.msra.mxu0 %v2721_v13  ;;  %1309 = vmatprep.subr.bf16.mxu1 %v2878_v29 }
  0x1a   :  { %633 = vmatprep.subr.bf16.mxu0 %v2722_v14 }
  0x1c   :  { %1310 = vmatpush1.bf16.msra.mxu1 %v2788_v37 }
  0x1d   :  { %634 = vmatpush1.bf16.msra.mxu0 %v2724_v15  ;;  %1311 = vmatprep.subr.bf16.mxu1 %v2878_v29 }
  0x1e   :  { %635 = vmatprep.subr.bf16.mxu0 %v2725_v16 }
  0x20   :  { %1312 = vmatpush1.bf16.msra.mxu1 %v2789_v38 }
  0x21   :  { %636 = vmatpush1.bf16.msra.mxu0 %v2727_v20  ;;  %1313 = vmatprep.subr.bf16.mxu1 %v2878_v29 }
  0x22   :  { %637 = vmatprep.subr.bf16.mxu0 %v2728_v21 }
  0x24   :  { %1314 = vmatpush1.bf16.msra.mxu1 %v2793_v41 }
  0x25   :  { %638 = vmatpush1.bf16.msra.mxu0 %v2730_v24  ;;  %1315 = vmatprep.subr.bf16.mxu1 %v2878_v29 }
  0x26   :  { %639 = vmatprep.subr.bf16.mxu0 %v619_v26 }
  0x28   :  { %1316 = vmatpush1.bf16.msra.mxu1 %v2794_v42 }
  0x29   :  { %640 = vmatpush1.bf16.msra.mxu0 %v616_v28  ;;  %1317 = vmatprep.subr.bf16.mxu1 %v2878_v29 }
  0x2c   :  { %654 = vmatmul.mubr.bf16.vlgmr.msra.gmra.mrb[0].mxu0 %v2733_v31 }
  0x2d   :  { %2468 = vmatprep.mubr.msk.bf16.mxu0 %vm514_vm0, %v2736_v32 }
  0x34   :  { %664 = vmatmul.mubr.bf16.gmra.mrb[4].mxu0 %v2738_v35 }
  0x35   :  { %2469 = vmatprep.mubr.msk.bf16.mxu0 %vm514_vm0, %v2739_v36 }
  0x3c   :  { %674 = vmatmul.mubr.bf16.gmra.mrb[8].mxu0 %v2741_v39 }
  0x3d   :  { %2470 = vmatprep.mubr.msk.bf16.mxu0 %vm514_vm0, %v2742_v40 }
  0x44   :  { %684 = vmatmul.mubr.bf16.gmra.mrb[12].mxu0 %v2744_v43 }
  0x45   :  { %2471 = vmatprep.mubr.msk.bf16.mxu0 %vm514_vm0, %v2745_v44 }
  0x46   :  { %16 = vsyncpa [#allocation4], 0  ;;  %1318 = vmatpush1.bf16.msra.mxu1 %v2798_v45  ;;  %v2799_v46 = vld [vmem:[%s3693_s3 + $0x48] sm:$0xff]   ;;  %v2748_v48 = vld [vmem:[%s3690_s0 + $0x54] ss:$8 sps:$4 sm:$0xff]   ;;  %v121_v31 = vlaneseq  ;;  %vm2153_vm3 = vcmask 523264  }
  0x47   :  { %1319 = vmatprep.subr.bf16.mxu1 %v2878_v29  ;;  %v2747_v47 = vld [vmem:[%s3690_s0 + $0x40] ss:$8 sps:$4 sm:$0xff]   ;;  %v2803_v49 = vld [vmem:[%s3693_s3 + $0x50] sm:$0xff]   ;;  %v2804_v50 = vld [vmem:[%s3693_s3 + $0x58] sm:$0xff]  }
  0x48   :  { %v2750_v51 = vld [vmem:[%s3690_s0 + $0x50] ss:$8 sps:$4 sm:$0xff]   ;;  %v2751_v52 = vld [vmem:[%s3690_s0 + $0x64] ss:$8 sps:$4 sm:$0xff]   ;;  %v2753_v54 = vld [vmem:[%s3690_s0 + $0x60] ss:$8 sps:$4 sm:$0xff]  }
  0x49   :  { %v2808_v53 = vld [vmem:[%s3693_s3 + $0x60] sm:$0xff]   ;;  %v2754_v55 = vld [vmem:[%s3690_s0 + $0x74] ss:$8 sps:$4 sm:$0xff]   ;;  %v2756_v56 = vld [vmem:[%s3690_s0 + $0x70] ss:$8 sps:$4 sm:$0xff]   ;;  %v3242_v34 = vshrl.u32 %v121_v31, 7 }
  0x4a   :  { %1320 = vmatpush1.bf16.msra.mxu1 %v2799_v46  ;;  %v2757_v57 = vld [vmem:[%s3690_s0 + $0x84] ss:$8 sps:$4 sm:$0xff]   ;;  %v2759_v58 = vld [vmem:[%s3690_s0 + $0x80] ss:$8 sps:$4 sm:$0xff]   ;;  %v2760_v59 = vld [vmem:[%s3690_s0 + $0x94] ss:$8 sps:$4 sm:$0xff]  }
  0x4b   :  { %1321 = vmatprep.subr.bf16.mxu1 %v2878_v29  ;;  %v2762_v60 = vld [vmem:[%s3690_s0 + $0x90] ss:$8 sps:$4 sm:$0xff]   ;;  %v2763_v61 = vld [vmem:[%s3690_s0 + $0xa4] ss:$8 sps:$4 sm:$0xff]   ;;  %v2765_v62 = vld [vmem:[%s3690_s0 + $0xa0] ss:$8 sps:$4 sm:$0xff]  }
  0x4c   :  { %694 = vmatmul.mubr.bf16.gmra.mrb[16].mxu0 %v2747_v47  ;;  %v2766_v63 = vld [vmem:[%s3690_s0 + $0xb4] ss:$8 sps:$4 sm:$0xff]   ;;  %v2809_v0 = vld [vmem:[%s3693_s3 + $0x68] sm:$0xff]   ;;  %v2768_v1 = vld [vmem:[%s3690_s0 + $0xb0] ss:$8 sps:$4 sm:$0xff]   ;;  %v123_v35 = vsub.s32 0, %v3242_v34 }
  0x4d   :  { %2472 = vmatprep.mubr.msk.bf16.mxu0 %vm514_vm0, %v2748_v48  ;;  %v2769_v2 = vld [vmem:[%s3690_s0 + $0xc4] ss:$8 sps:$4 sm:$0xff]   ;;  %v2813_v3 = vld [vmem:[%s3693_s3 + $0x70] sm:$0xff]   ;;  %v2814_v4 = vld [vmem:[%s3693_s3 + $0x78] sm:$0xff]   ;;  %v127_v38 = vsub.s32 1, %v3242_v34  ;;  %vm2366_vm4 = vcmp.lt.s32.totalorder %v121_v31, 512 }
  0x4e   :  { %1322 = vmatpush1.bf16.msra.mxu1 %v2803_v49  ;;  %v2771_v5 = vld [vmem:[%s3690_s0 + $0xc0] ss:$8 sps:$4 sm:$0xff]   ;;  %v2772_v6 = vld [vmem:[%s3690_s0 + $0xd4] ss:$8 sps:$4 sm:$0xff]   ;;  %v2774_v7 = vld [vmem:[%s3690_s0 + $0xd0] ss:$8 sps:$4 sm:$0xff]  }
  0x4f   :  { %1323 = vmatprep.subr.bf16.mxu1 %v2878_v29  ;;  %v2775_v8 = vld [vmem:[%s3690_s0 + $0xe4] ss:$8 sps:$4 sm:$0xff]   ;;  %v2777_v9 = vld [vmem:[%s3690_s0 + $0xe0] ss:$8 sps:$4 sm:$0xff]   ;;  %v2778_v10 = vld [vmem:[%s3690_s0 + $0xf4] ss:$8 sps:$4 sm:$0xff]  }
  0x50   :  { %v2780_v11 = vld [vmem:[%s3690_s0 + $0xf0] ss:$8 sps:$4 sm:$0xff]   ;;  %v2785_v12 = vld [vmem:[%s3690_s0 + $0x104] ss:$8 sps:$4 sm:$0xff]   ;;  %v2787_v13 = vld [vmem:[%s3690_s0 + $0x100] ss:$8 sps:$4 sm:$0xff]  }
  0x51   :  { %v2790_v14 = vld [vmem:[%s3690_s0 + $0x114] ss:$8 sps:$4 sm:$0xff]   ;;  %v2792_v15 = vld [vmem:[%s3690_s0 + $0x110] ss:$8 sps:$4 sm:$0xff]   ;;  %v2795_v16 = vld [vmem:[%s3690_s0 + $0x124] ss:$8 sps:$4 sm:$0xff]  }
  0x52   :  { %1324 = vmatpush1.bf16.msra.mxu1 %v2804_v50  ;;  %v2797_v17 = vld [vmem:[%s3690_s0 + $0x120] ss:$8 sps:$4 sm:$0xff]   ;;  %v2800_v18 = vld [vmem:[%s3690_s0 + $0x134] ss:$8 sps:$4 sm:$0xff]   ;;  %v2802_v19 = vld [vmem:[%s3690_s0 + $0x130] ss:$8 sps:$4 sm:$0xff]  }
  0x53   :  { %1325 = vmatprep.subr.bf16.mxu1 %v2878_v29  ;;  %v2805_v20 = vld [vmem:[%s3690_s0 + $0x144] ss:$8 sps:$4 sm:$0xff]   ;;  %v2807_v21 = vld [vmem:[%s3690_s0 + $0x140] ss:$8 sps:$4 sm:$0xff]   ;;  %v2810_v22 = vld [vmem:[%s3690_s0 + $0x154] ss:$8 sps:$4 sm:$0xff]  }
  0x54   :  { %704 = vmatmul.mubr.bf16.gmra.mrb[20].mxu0 %v2750_v51  ;;  %v2812_v23 = vld [vmem:[%s3690_s0 + $0x150] ss:$8 sps:$4 sm:$0xff]   ;;  %v2815_v24 = vld [vmem:[%s3690_s0 + $0x164] ss:$8 sps:$4 sm:$0xff]   ;;  %v2817_v25 = vld [vmem:[%s3690_s0 + $0x160] ss:$8 sps:$4 sm:$0xff]  }
  0x55   :  { %2473 = vmatprep.mubr.msk.bf16.mxu0 %vm514_vm0, %v2751_v52  ;;  %v2818_v26 = vld [vmem:[%s3690_s0 + $0x174] ss:$8 sps:$4 sm:$0xff]   ;;  %v2820_v27 = vld [vmem:[%s3690_s0 + $0x170] ss:$8 sps:$4 sm:$0xff]   ;;  %v2821_v28 = vld [vmem:[%s3690_s0 + $0x184] ss:$8 sps:$4 sm:$0xff]  }
  0x56   :  { %1326 = vmatpush1.bf16.msra.mxu1 %v2808_v53  ;;  %v2824_v30 = vld [vmem:[%s3690_s0 + $0x194] ss:$8 sps:$4 sm:$0xff]   ;;  %v2826_v32 = vld [vmem:[%s3690_s0 + $0x190] ss:$8 sps:$4 sm:$0xff]   ;;  %v2827_v33 = vld [vmem:[%s3690_s0 + $0x1a4] ss:$8 sps:$4 sm:$0xff]  }
  0x57   :  { %1327 = vmatprep.subr.bf16.mxu1 %v2878_v29  ;;  %v2829_v36 = vld [vmem:[%s3690_s0 + $0x1a0] ss:$8 sps:$4 sm:$0xff]   ;;  %v2830_v39 = vld [vmem:[%s3690_s0 + $0x1b4] ss:$8 sps:$4 sm:$0xff]   ;;  %v2832_v45 = vld [vmem:[%s3690_s0 + $0x1b0] ss:$8 sps:$4 sm:$0xff]  }
  0x58   :  { %v119_v37 = vld [vmem:[%s3692_s2] sm:$0x3]  ;;  %v2833_v48 = vld [vmem:[%s3690_s0 + $0x1c4] ss:$8 sps:$4 sm:$0xff]  }
  0x59   :  { %v3258_v40 = vrot.slane %v119_v37, %v123_v35  ;;  %v3260_v41 = vrot.slane %v119_v37, %v127_v38 }
  0x5a   :  { %1328 = vmatpush1.bf16.msra.mxu1 %v2809_v0  ;;  %v2836_v0 = vld [vmem:[%s3690_s0 + $0x1d4] ss:$8 sps:$4 sm:$0xff]  }
  0x5b   :  { %1329 = vmatprep.subr.bf16.mxu1 %v2878_v29 }
  0x5c   :  { %714 = vmatmul.mubr.bf16.gmra.mrb[24].mxu0 %v2753_v54 }
  0x5d   :  { %2474 = vmatprep.mubr.msk.bf16.mxu0 %vm514_vm0, %v2754_v55 }
  0x5e   :  { %1330 = vmatpush1.bf16.msra.mxu1 %v2813_v3 }
  0x5f   :  { %1331 = vmatprep.subr.bf16.mxu1 %v2878_v29  ;;  %v2823_v29 = vld [vmem:[%s3690_s0 + $0x180] ss:$8 sps:$4 sm:$0xff]  }
  0x62   :  { %1332 = vmatpush1.bf16.msra.mxu1 %v2814_v4 }
  0x64   :  { %724 = vmatmul.mubr.bf16.gmra.mrb[28].mxu0 %v2756_v56 }
  0x65   :  { %2475 = vmatprep.mubr.msk.bf16.mxu0 %vm514_vm0, %v2757_v57 }
  0x6c   :  { %734 = vmatmul.mubr.bf16.gmra.mrb[32].mxu0 %v2759_v58 }
  0x6d   :  { %2476 = vmatprep.mubr.msk.bf16.mxu0 %vm514_vm0, %v2760_v59 }
  0x74   :  { %744 = vmatmul.mubr.bf16.gmra.mrb[36].mxu0 %v2762_v60 }
  0x75   :  { %2477 = vmatprep.mubr.msk.bf16.mxu0 %vm514_vm0, %v2763_v61  ;;  %v2835_v61 = vld [vmem:[%s3690_s0 + $0x1c0] ss:$8 sps:$4 sm:$0xff]  }
  0x7c   :  { %754 = vmatmul.mubr.bf16.gmra.mrb[40].mxu0 %v2765_v62 }
  0x7d   :  { %2478 = vmatprep.mubr.msk.bf16.mxu0 %vm514_vm0, %v2766_v63 }
  0x84   :  { %764 = vmatmul.mubr.bf16.gmra.mrb[44].mxu0 %v2768_v1 }
  0x85   :  { %2479 = vmatprep.mubr.msk.bf16.mxu0 %vm514_vm0, %v2769_v2 }
  0x8c   :  { %774 = vmatmul.mubr.bf16.gmra.mrb[48].mxu0 %v2771_v5 }
  0x8d   :  { %2480 = vmatprep.mubr.msk.bf16.mxu0 %vm514_vm0, %v2772_v6 }
  0x94   :  { %784 = vmatmul.mubr.bf16.gmra.mrb[52].mxu0 %v2774_v7 }
  0x95   :  { %2481 = vmatprep.mubr.msk.bf16.mxu0 %vm514_vm0, %v2775_v8 }
  0x9c   :  { %794 = vmatmul.mubr.bf16.gmra.mrb[56].mxu0 %v2777_v9 }
  0x9d   :  { %2482 = vmatprep.mubr.msk.bf16.mxu0 %vm514_vm0, %v2778_v10 }
  0xa4   :  { %804 = vmatmul.mubr.bf16.gmra.mrb[60].mxu0 %v2780_v11 }
  0xa5   :  { %2483 = vmatprep.mubr.msk.bf16.mxu0 %vm514_vm0, %v2785_v12 }
  0xac   :  { %814 = vmatmul.mubr.bf16.gmra.mrb[64].mxu0 %v2787_v13  ;;  %v2838_v13 = vld [vmem:[%s3690_s0 + $0x1d0] ss:$8 sps:$4 sm:$0xff]  }
  0xad   :  { %2484 = vmatprep.mubr.msk.bf16.mxu0 %vm514_vm0, %v2790_v14 }
  0xb4   :  { %824 = vmatmul.mubr.bf16.gmra.mrb[68].mxu0 %v2792_v15 }
  0xb5   :  { %2485 = vmatprep.mubr.msk.bf16.mxu0 %vm514_vm0, %v2795_v16  ;;  %v2839_v16 = vld [vmem:[%s3690_s0 + $0x1e4] ss:$8 sps:$4 sm:$0xff]  }
  0xbc   :  { %834 = vmatmul.mubr.bf16.gmra.mrb[72].mxu0 %v2797_v17 }
  0xbd   :  { %2486 = vmatprep.mubr.msk.bf16.mxu0 %vm514_vm0, %v2800_v18 }
  0xc4   :  { %844 = vmatmul.mubr.bf16.gmra.mrb[76].mxu0 %v2802_v19 }
  0xc5   :  { %2487 = vmatprep.mubr.msk.bf16.mxu0 %vm514_vm0, %v2805_v20 }
  0xcc   :  { %854 = vmatmul.mubr.bf16.gmra.mrb[80].mxu0 %v2807_v21 }
  0xcd   :  { %2488 = vmatprep.mubr.msk.bf16.mxu0 %vm514_vm0, %v2810_v22 }
  0xd4   :  { %864 = vmatmul.mubr.bf16.gmra.mrb[84].mxu0 %v2812_v23 }
  0xd5   :  { %2489 = vmatprep.mubr.msk.bf16.mxu0 %vm514_vm0, %v2815_v24 }
  0xdc   :  { %874 = vmatmul.mubr.bf16.gmra.mrb[88].mxu0 %v2817_v25 }
  0xdd   :  { %2490 = vmatprep.mubr.msk.bf16.mxu0 %vm514_vm0, %v2818_v26 }
  0xe4   :  { %884 = vmatmul.mubr.bf16.gmra.mrb[92].mxu0 %v2820_v27 }
  0xe5   :  { %2491 = vmatprep.mubr.msk.bf16.mxu0 %vm514_vm0, %v2821_v28 }
  0xec   :  { %894 = vmatmul.mubr.bf16.gmra.mrb[96].mxu0 %v2823_v29  ;;  %v2841_v29 = vld [vmem:[%s3690_s0 + $0x1e0] ss:$8 sps:$4 sm:$0xff]  }
  0xed   :  { %2492 = vmatprep.mubr.msk.bf16.mxu0 %vm514_vm0, %v2824_v30 }
  0xf4   :  { %904 = vmatmul.mubr.bf16.gmra.mrb[100].mxu0 %v2826_v32 }
  0xf5   :  { %2493 = vmatprep.mubr.msk.bf16.mxu0 %vm514_vm0, %v2827_v33  ;;  %v2842_v33 = vld [vmem:[%s3690_s0 + $0x1f4] ss:$8 sps:$4 sm:$0xff]  }
  0xfc   :  { %914 = vmatmul.mubr.bf16.gmra.mrb[104].mxu0 %v2829_v36 }
  0xfd   :  { %2494 = vmatprep.mubr.msk.bf16.mxu0 %vm514_vm0, %v2830_v39 }
  0xff   :  { %v655_v42 = vpop.f32.mrb[0].mxu0 }
 0x100   :  { %v656_v43 = vadd.f32 %v655_v42, %v3258_v40  ;;  %v657_v44 = vpop.f32.mrb[1].mxu0 }
 0x101   :  { %v658_v46 = vadd.f32 %v657_v44, %v3260_v41  ;;  %v659_v47 = vpop.f32.mrb[2].mxu0 }
 0x102   :  { %v660_v49 = vadd.f32 %v659_v47, %v3258_v40  ;;  %v661_v50 = vpop.f32.mrb[3].mxu0  ;;  %v974_v52 = vmax.f32 %v656_v43, 0.0 }
 0x103   :  { %v662_v51 = vadd.f32 %v661_v50, %v3260_v41  ;;  %v975_v54 = vmax.f32 %v658_v46, 0.0 }
 0x104   :  { %v976_v53 = vmax.f32 %v660_v49, 0.0  ;;  %924 = vmatmul.mubr.bf16.gmra.mrb[108].mxu0 %v2832_v45 }
 0x105   :  { %v977_v55 = vmax.f32 %v662_v51, 0.0  ;;  %2495 = vmatprep.mubr.msk.bf16.mxu0 %vm514_vm0, %v2833_v48  ;;  %v2845_v48 = vld [vmem:[%s3695_s5] sm:$0xff]   ;;  %v2844_v51 = vld [vmem:[%s3690_s0 + $0x1f0] ss:$8 sps:$4 sm:$0xff]  }
 0x106   :  { %v1102_v56 = vpack.c.bf16 %v976_v53, %v974_v52  ;;  %2603 = vmatprep.subr.bf16.mxu0 %v2845_v48 }
 0x107   :  { %v665_v57 = vpop.f32.mrb[4].mxu0  ;;  %v1103_v58 = vpack.c.bf16 %v977_v55, %v975_v54  ;;  %2604 = vmatpush3.bf16.msra.mxu0 %v2845_v48 }
 0x108   :  { %v666_v59 = vadd.f32 %v665_v57, %v3258_v40  ;;  %v667_v60 = vpop.f32.mrb[5].mxu0 }
 0x109   :  { %v668_v62 = vadd.f32 %v667_v60, %v3260_v41  ;;  %v669_v63 = vpop.f32.mrb[6].mxu0  ;;  %1333 = vmatprep.mubr.bf16.mxu1 %v1103_v58 }
 0x10a   :  { %v670_v1 = vadd.f32 %v669_v63, %v3258_v40  ;;  %v671_v2 = vpop.f32.mrb[7].mxu0  ;;  %1334 = vmatmul.mubr.bf16.vlgmr.msra.gmra.mrb[0].mxu1 %v1102_v56  ;;  %v978_v4 = vmax.f32 %v666_v59, 0.0 }
 0x10b   :  { %v672_v3 = vadd.f32 %v671_v2, %v3260_v41  ;;  %v979_v6 = vmax.f32 %v668_v62, 0.0 }
 0x10c   :  { %v980_v5 = vmax.f32 %v670_v1, 0.0  ;;  %934 = vmatmul.mubr.bf16.gmra.mrb[112].mxu0 %v2835_v61 }
 0x10d   :  { %v981_v7 = vmax.f32 %v672_v3, 0.0  ;;  %2496 = vmatprep.mubr.msk.bf16.mxu0 %vm514_vm0, %v2836_v0  ;;  %v2846_v0 = vld [vmem:[%s3695_s5 + $0x8] sm:$0xff]  }
 0x10e   :  { %v1104_v8 = vpack.c.bf16 %v980_v5, %v978_v4  ;;  %2605 = vmatprep.subr.bf16.mxu0 %v2846_v0 }
 0x10f   :  { %v1105_v9 = vpack.c.bf16 %v981_v7, %v979_v6  ;;  %v675_v10 = vpop.f32.mrb[8].mxu0  ;;  %2606 = vmatpush3.bf16.msra.mxu0 %v2846_v0  ;;  %v2847_v7 = vld [vmem:[%s3695_s5 + $0x10] sm:$0xff]  }
 0x110   :  { %v676_v11 = vadd.f32 %v675_v10, %v3258_v40  ;;  %v677_v12 = vpop.f32.mrb[9].mxu0  ;;  %2607 = vmatprep.subr.bf16.mxu0 %v2847_v7 }
 0x111   :  { %v678_v14 = vadd.f32 %v677_v12, %v3260_v41  ;;  %v679_v15 = vpop.f32.mrb[10].mxu0  ;;  %1341 = vmatprep.mubr.bf16.mxu1 %v1105_v9 }
 0x112   :  { %v680_v17 = vadd.f32 %v679_v15, %v3258_v40  ;;  %v681_v18 = vpop.f32.mrb[11].mxu0  ;;  %1342 = vmatmul.mubr.bf16.gmra.mrb[4].mxu1 %v1104_v8  ;;  %v982_v20 = vmax.f32 %v676_v11, 0.0 }
 0x113   :  { %v682_v19 = vadd.f32 %v681_v18, %v3260_v41  ;;  %v983_v22 = vmax.f32 %v678_v14, 0.0  ;;  %2608 = vmatpush3.bf16.msra.mxu0 %v2847_v7 }
 0x114   :  { %v984_v21 = vmax.f32 %v680_v17, 0.0  ;;  %944 = vmatmul.mubr.bf16.gmra.mrb[116].mxu0 %v2838_v13 }
 0x115   :  { %v985_v23 = vmax.f32 %v682_v19, 0.0  ;;  %2497 = vmatprep.mubr.msk.bf16.mxu0 %vm514_vm0, %v2839_v16  ;;  %v2848_v16 = vld [vmem:[%s3695_s5 + $0x18] sm:$0xff]  }
 0x116   :  { %v1106_v24 = vpack.c.bf16 %v984_v21, %v982_v20  ;;  %2609 = vmatprep.subr.bf16.mxu0 %v2848_v16 }
 0x117   :  { %v1107_v25 = vpack.c.bf16 %v985_v23, %v983_v22  ;;  %v685_v26 = vpop.f32.mrb[12].mxu0  ;;  %2610 = vmatpush3.bf16.msra.mxu0 %v2848_v16 }
 0x118   :  { %v686_v27 = vadd.f32 %v685_v26, %v3258_v40  ;;  %v687_v28 = vpop.f32.mrb[13].mxu0 }
 0x119   :  { %v688_v30 = vadd.f32 %v687_v28, %v3260_v41  ;;  %v689_v32 = vpop.f32.mrb[14].mxu0  ;;  %1349 = vmatprep.mubr.bf16.mxu1 %v1107_v25 }
 0x11a   :  { %v690_v36 = vadd.f32 %v689_v32, %v3258_v40  ;;  %v691_v37 = vpop.f32.mrb[15].mxu0  ;;  %1350 = vmatmul.mubr.bf16.gmra.mrb[8].mxu1 %v1106_v24  ;;  %v986_v39 = vmax.f32 %v686_v27, 0.0 }
 0x11b   :  { %v692_v38 = vadd.f32 %v691_v37, %v3260_v41  ;;  %v987_v43 = vmax.f32 %v688_v30, 0.0 }
 0x11c   :  { %v988_v42 = vmax.f32 %v690_v36, 0.0  ;;  %954 = vmatmul.mubr.bf16.gmra.mrb[120].mxu0 %v2841_v29 }
 0x11d   :  { %v989_v44 = vmax.f32 %v692_v38, 0.0  ;;  %2498 = vmatprep.mubr.msk.bf16.mxu0 %vm514_vm0, %v2842_v33 }
 0x11e   :  { %v1108_v45 = vpack.c.bf16 %v988_v42, %v986_v39 }
 0x11f   :  { %v1109_v46 = vpack.c.bf16 %v989_v44, %v987_v43  ;;  %v695_v47 = vpop.f32.mrb[16].mxu0 }
 0x120   :  { %v696_v49 = vadd.f32 %v695_v47, %v3258_v40  ;;  %v697_v50 = vpop.f32.mrb[17].mxu0 }
 0x121   :  { %v698_v52 = vadd.f32 %v697_v50, %v3260_v41  ;;  %v699_v53 = vpop.f32.mrb[18].mxu0  ;;  %1357 = vmatprep.mubr.bf16.mxu1 %v1109_v46 }
 0x122   :  { %v700_v54 = vadd.f32 %v699_v53, %v3258_v40  ;;  %v701_v55 = vpop.f32.mrb[19].mxu0  ;;  %1358 = vmatmul.mubr.bf16.gmra.mrb[12].mxu1 %v1108_v45  ;;  %v990_v57 = vmax.f32 %v696_v49, 0.0 }
 0x123   :  { %v702_v56 = vadd.f32 %v701_v55, %v3260_v41  ;;  %v991_v59 = vmax.f32 %v698_v52, 0.0 }
 0x124   :  { %v992_v58 = vmax.f32 %v700_v54, 0.0  ;;  %964 = vmatmul.mubr.bf16.gmra.mrb[124].mxu0 %v2844_v51 }
 0x125   :  { %v993_v60 = vmax.f32 %v702_v56, 0.0 }
 0x126   :  { %v1110_v61 = vpack.c.bf16 %v992_v58, %v990_v57 }
 0x127   :  { %v1111_v62 = vpack.c.bf16 %v993_v60, %v991_v59  ;;  %v705_v63 = vpop.f32.mrb[20].mxu0 }
 0x128   :  { %v706_v1 = vadd.f32 %v705_v63, %v3258_v40  ;;  %v707_v2 = vpop.f32.mrb[21].mxu0 }
 0x129   :  { %v708_v3 = vadd.f32 %v707_v2, %v3260_v41  ;;  %v709_v4 = vpop.f32.mrb[22].mxu0  ;;  %1365 = vmatprep.mubr.bf16.mxu1 %v1111_v62 }
 0x12a   :  { %v710_v5 = vadd.f32 %v709_v4, %v3258_v40  ;;  %v711_v6 = vpop.f32.mrb[23].mxu0  ;;  %1366 = vmatmul.mubr.bf16.gmra.mrb[16].mxu1 %v1110_v61  ;;  %v994_v9 = vmax.f32 %v706_v1, 0.0 }
 0x12b   :  { %v712_v8 = vadd.f32 %v711_v6, %v3260_v41  ;;  %v995_v11 = vmax.f32 %v708_v3, 0.0 }
 0x12c   :  { %v996_v10 = vmax.f32 %v710_v5, 0.0 }
 0x12d   :  { %v997_v12 = vmax.f32 %v712_v8, 0.0 }
 0x12e   :  { %v1112_v13 = vpack.c.bf16 %v996_v10, %v994_v9 }
 0x12f   :  { %v1113_v14 = vpack.c.bf16 %v997_v12, %v995_v11  ;;  %v715_v15 = vpop.f32.mrb[24].mxu0 }
 0x130   :  { %v716_v17 = vadd.f32 %v715_v15, %v3258_v40  ;;  %v717_v18 = vpop.f32.mrb[25].mxu0 }
 0x131   :  { %v718_v19 = vadd.f32 %v717_v18, %v3260_v41  ;;  %v719_v20 = vpop.f32.mrb[26].mxu0  ;;  %1373 = vmatprep.mubr.bf16.mxu1 %v1113_v14 }
 0x132   :  { %v720_v21 = vadd.f32 %v719_v20, %v3258_v40  ;;  %v721_v22 = vpop.f32.mrb[27].mxu0  ;;  %1374 = vmatmul.mubr.bf16.gmra.mrb[20].mxu1 %v1112_v13  ;;  %v998_v24 = vmax.f32 %v716_v17, 0.0 }
 0x133   :  { %v722_v23 = vadd.f32 %v721_v22, %v3260_v41  ;;  %v999_v26 = vmax.f32 %v718_v19, 0.0 }
 0x134   :  { %v1000_v25 = vmax.f32 %v720_v21, 0.0 }
 0x135   :  { %v1001_v27 = vmax.f32 %v722_v23, 0.0 }
 0x136   :  { %v1114_v28 = vpack.c.bf16 %v1000_v25, %v998_v24 }
 0x137   :  { %v1115_v29 = vpack.c.bf16 %v1001_v27, %v999_v26  ;;  %v725_v30 = vpop.f32.mrb[28].mxu0 }
 0x138   :  { %v726_v32 = vadd.f32 %v725_v30, %v3258_v40  ;;  %v727_v33 = vpop.f32.mrb[29].mxu0 }
 0x139   :  { %v728_v36 = vadd.f32 %v727_v33, %v3260_v41  ;;  %v729_v37 = vpop.f32.mrb[30].mxu0  ;;  %1381 = vmatprep.mubr.bf16.mxu1 %v1115_v29 }
 0x13a   :  { %v730_v38 = vadd.f32 %v729_v37, %v3258_v40  ;;  %v731_v39 = vpop.f32.mrb[31].mxu0  ;;  %1382 = vmatmul.mubr.bf16.gmra.mrb[24].mxu1 %v1114_v28  ;;  %v1002_v43 = vmax.f32 %v726_v32, 0.0 }
 0x13b   :  { %v732_v42 = vadd.f32 %v731_v39, %v3260_v41  ;;  %v1003_v45 = vmax.f32 %v728_v36, 0.0 }
 0x13c   :  { %v1004_v44 = vmax.f32 %v730_v38, 0.0 }
 0x13d   :  { %v1005_v46 = vmax.f32 %v732_v42, 0.0  ;;  %v2849_v42 = vld [vmem:[%s3695_s5 + $0x20] sm:$0xff]  }
 0x13e   :  { %v1116_v47 = vpack.c.bf16 %v1004_v44, %v1002_v43  ;;  %2611 = vmatprep.subr.bf16.mxu0 %v2849_v42 }
 0x13f   :  { %v1117_v48 = vpack.c.bf16 %v1005_v46, %v1003_v45  ;;  %v735_v49 = vpop.f32.mrb[32].mxu0  ;;  %2612 = vmatpush3.bf16.msra.mxu0 %v2849_v42 }
 0x140   :  { %v736_v50 = vadd.f32 %v735_v49, %v3258_v40  ;;  %v737_v51 = vpop.f32.mrb[33].mxu0 }
 0x141   :  { %v738_v52 = vadd.f32 %v737_v51, %v3260_v41  ;;  %v739_v53 = vpop.f32.mrb[34].mxu0  ;;  %1389 = vmatprep.mubr.bf16.mxu1 %v1117_v48 }
 0x142   :  { %v740_v54 = vadd.f32 %v739_v53, %v3258_v40  ;;  %v741_v55 = vpop.f32.mrb[35].mxu0  ;;  %1390 = vmatmul.mubr.bf16.gmra.mrb[28].mxu1 %v1116_v47  ;;  %v1006_v57 = vmax.f32 %v736_v50, 0.0  ;;  %v2850_v50 = vld [vmem:[%s3695_s5 + $0x28] sm:$0xff]  }
 0x143   :  { %v742_v56 = vadd.f32 %v741_v55, %v3260_v41  ;;  %v1007_v59 = vmax.f32 %v738_v52, 0.0  ;;  %2613 = vmatprep.subr.bf16.mxu0 %v2850_v50 }
 0x144   :  { %v1008_v58 = vmax.f32 %v740_v54, 0.0  ;;  %2614 = vmatpush3.bf16.msra.mxu0 %v2850_v50 }
 0x145   :  { %v1009_v60 = vmax.f32 %v742_v56, 0.0 }
 0x146   :  { %v1118_v61 = vpack.c.bf16 %v1008_v58, %v1006_v57  ;;  %v2851_v58 = vld [vmem:[%s3695_s5 + $0x30] sm:$0xff]  }
 0x147   :  { %v1119_v62 = vpack.c.bf16 %v1009_v60, %v1007_v59  ;;  %v745_v63 = vpop.f32.mrb[36].mxu0  ;;  %2615 = vmatprep.subr.bf16.mxu0 %v2851_v58 }
 0x148   :  { %v746_v0 = vadd.f32 %v745_v63, %v3258_v40  ;;  %v747_v1 = vpop.f32.mrb[37].mxu0  ;;  %2616 = vmatpush3.bf16.msra.mxu0 %v2851_v58 }
 0x149   :  { %v748_v2 = vadd.f32 %v747_v1, %v3260_v41  ;;  %v749_v3 = vpop.f32.mrb[38].mxu0  ;;  %1397 = vmatprep.mubr.bf16.mxu1 %v1119_v62 }
 0x14a   :  { %v750_v4 = vadd.f32 %v749_v3, %v3258_v40  ;;  %v751_v5 = vpop.f32.mrb[39].mxu0  ;;  %1398 = vmatmul.mubr.bf16.gmra.mrb[32].mxu1 %v1118_v61  ;;  %v1010_v7 = vmax.f32 %v746_v0, 0.0 }
 0x14b   :  { %v752_v6 = vadd.f32 %v751_v5, %v3260_v41  ;;  %v1011_v9 = vmax.f32 %v748_v2, 0.0  ;;  %v2852_v2 = vld [vmem:[%s3695_s5 + $0x38] sm:$0xff]  }
 0x14c   :  { %v1012_v8 = vmax.f32 %v750_v4, 0.0  ;;  %2617 = vmatprep.subr.bf16.mxu0 %v2852_v2 }
 0x14d   :  { %v1013_v10 = vmax.f32 %v752_v6, 0.0  ;;  %2618 = vmatpush3.bf16.msra.mxu0 %v2852_v2 }
 0x14e   :  { %v1120_v11 = vpack.c.bf16 %v1012_v8, %v1010_v7 }
 0x14f   :  { %v1121_v12 = vpack.c.bf16 %v1013_v10, %v1011_v9  ;;  %v755_v13 = vpop.f32.mrb[40].mxu0 }
 0x150   :  { %v756_v14 = vadd.f32 %v755_v13, %v3258_v40  ;;  %v757_v15 = vpop.f32.mrb[41].mxu0 }
 0x151   :  { %v758_v16 = vadd.f32 %v757_v15, %v3260_v41  ;;  %v759_v17 = vpop.f32.mrb[42].mxu0  ;;  %1405 = vmatprep.mubr.bf16.mxu1 %v1121_v12 }
 0x152   :  { %v760_v18 = vadd.f32 %v759_v17, %v3258_v40  ;;  %v761_v19 = vpop.f32.mrb[43].mxu0  ;;  %1406 = vmatmul.mubr.bf16.gmra.mrb[36].mxu1 %v1120_v11  ;;  %v1014_v21 = vmax.f32 %v756_v14, 0.0 }
 0x153   :  { %v762_v20 = vadd.f32 %v761_v19, %v3260_v41  ;;  %v1015_v23 = vmax.f32 %v758_v16, 0.0 }
 0x154   :  { %v1016_v22 = vmax.f32 %v760_v18, 0.0 }
 0x155   :  { %v1017_v24 = vmax.f32 %v762_v20, 0.0 }
 0x156   :  { %v1122_v25 = vpack.c.bf16 %v1016_v22, %v1014_v21 }
 0x157   :  { %v1123_v26 = vpack.c.bf16 %v1017_v24, %v1015_v23  ;;  %v765_v27 = vpop.f32.mrb[44].mxu0 }
 0x158   :  { %v766_v28 = vadd.f32 %v765_v27, %v3258_v40  ;;  %v767_v29 = vpop.f32.mrb[45].mxu0 }
 0x159   :  { %v768_v30 = vadd.f32 %v767_v29, %v3260_v41  ;;  %v769_v32 = vpop.f32.mrb[46].mxu0  ;;  %1413 = vmatprep.mubr.bf16.mxu1 %v1123_v26 }
 0x15a   :  { %v770_v33 = vadd.f32 %v769_v32, %v3258_v40  ;;  %v771_v36 = vpop.f32.mrb[47].mxu0  ;;  %1414 = vmatmul.mubr.bf16.gmra.mrb[40].mxu1 %v1122_v25  ;;  %v1018_v38 = vmax.f32 %v766_v28, 0.0 }
 0x15b   :  { %v772_v37 = vadd.f32 %v771_v36, %v3260_v41  ;;  %v1019_v43 = vmax.f32 %v768_v30, 0.0 }
 0x15c   :  { %v1020_v39 = vmax.f32 %v770_v33, 0.0 }
 0x15d   :  { %v1021_v44 = vmax.f32 %v772_v37, 0.0 }
 0x15e   :  { %v1124_v45 = vpack.c.bf16 %v1020_v39, %v1018_v38 }
 0x15f   :  { %v1125_v46 = vpack.c.bf16 %v1021_v44, %v1019_v43  ;;  %v775_v47 = vpop.f32.mrb[48].mxu0 }
 0x160   :  { %v776_v48 = vadd.f32 %v775_v47, %v3258_v40  ;;  %v777_v49 = vpop.f32.mrb[49].mxu0 }
 0x161   :  { %v778_v51 = vadd.f32 %v777_v49, %v3260_v41  ;;  %v779_v52 = vpop.f32.mrb[50].mxu0  ;;  %1421 = vmatprep.mubr.bf16.mxu1 %v1125_v46 }
 0x162   :  { %v780_v53 = vadd.f32 %v779_v52, %v3258_v40  ;;  %v781_v54 = vpop.f32.mrb[51].mxu0  ;;  %1422 = vmatmul.mubr.bf16.gmra.mrb[44].mxu1 %v1124_v45  ;;  %v1022_v56 = vmax.f32 %v776_v48, 0.0 }
 0x163   :  { %v782_v55 = vadd.f32 %v781_v54, %v3260_v41  ;;  %v1023_v59 = vmax.f32 %v778_v51, 0.0 }
 0x164   :  { %v1024_v57 = vmax.f32 %v780_v53, 0.0 }
 0x165   :  { %v1025_v60 = vmax.f32 %v782_v55, 0.0 }
 0x166   :  { %v1126_v61 = vpack.c.bf16 %v1024_v57, %v1022_v56 }
 0x167   :  { %v1127_v62 = vpack.c.bf16 %v1025_v60, %v1023_v59  ;;  %v785_v63 = vpop.f32.mrb[52].mxu0 }
 0x168   :  { %v786_v0 = vadd.f32 %v785_v63, %v3258_v40  ;;  %v787_v1 = vpop.f32.mrb[53].mxu0 }
 0x169   :  { %v788_v3 = vadd.f32 %v787_v1, %v3260_v41  ;;  %v789_v4 = vpop.f32.mrb[54].mxu0  ;;  %1429 = vmatprep.mubr.bf16.mxu1 %v1127_v62 }
 0x16a   :  { %v790_v5 = vadd.f32 %v789_v4, %v3258_v40  ;;  %v791_v6 = vpop.f32.mrb[55].mxu0  ;;  %1430 = vmatmul.mubr.bf16.gmra.mrb[48].mxu1 %v1126_v61  ;;  %v1026_v8 = vmax.f32 %v786_v0, 0.0 }
 0x16b   :  { %v792_v7 = vadd.f32 %v791_v6, %v3260_v41  ;;  %v1027_v10 = vmax.f32 %v788_v3, 0.0 }
 0x16c   :  { %v1028_v9 = vmax.f32 %v790_v5, 0.0 }
 0x16d   :  { %v1029_v11 = vmax.f32 %v792_v7, 0.0 }
 0x16e   :  { %v1128_v12 = vpack.c.bf16 %v1028_v9, %v1026_v8 }
 0x16f   :  { %v1129_v13 = vpack.c.bf16 %v1029_v11, %v1027_v10  ;;  %v795_v14 = vpop.f32.mrb[56].mxu0 }
 0x170   :  { %v796_v15 = vadd.f32 %v795_v14, %v3258_v40  ;;  %v797_v16 = vpop.f32.mrb[57].mxu0 }
 0x171   :  { %v798_v17 = vadd.f32 %v797_v16, %v3260_v41  ;;  %v799_v18 = vpop.f32.mrb[58].mxu0  ;;  %1437 = vmatprep.mubr.bf16.mxu1 %v1129_v13 }
 0x172   :  { %v800_v19 = vadd.f32 %v799_v18, %v3258_v40  ;;  %v801_v20 = vpop.f32.mrb[59].mxu0  ;;  %1438 = vmatmul.mubr.bf16.gmra.mrb[52].mxu1 %v1128_v12  ;;  %v1030_v22 = vmax.f32 %v796_v15, 0.0 }
 0x173   :  { %v802_v21 = vadd.f32 %v801_v20, %v3260_v41  ;;  %v1031_v24 = vmax.f32 %v798_v17, 0.0 }
 0x174   :  { %v1032_v23 = vmax.f32 %v800_v19, 0.0 }
 0x175   :  { %v1033_v25 = vmax.f32 %v802_v21, 0.0 }
 0x176   :  { %v1130_v26 = vpack.c.bf16 %v1032_v23, %v1030_v22 }
 0x177   :  { %v1131_v27 = vpack.c.bf16 %v1033_v25, %v1031_v24  ;;  %v805_v28 = vpop.f32.mrb[60].mxu0 }
 0x178   :  { %v806_v29 = vadd.f32 %v805_v28, %v3258_v40  ;;  %v807_v30 = vpop.f32.mrb[61].mxu0 }
 0x179   :  { %v808_v32 = vadd.f32 %v807_v30, %v3260_v41  ;;  %v809_v33 = vpop.f32.mrb[62].mxu0  ;;  %1445 = vmatprep.mubr.bf16.mxu1 %v1131_v27 }
 0x17a   :  { %v810_v36 = vadd.f32 %v809_v33, %v3258_v40  ;;  %v811_v37 = vpop.f32.mrb[63].mxu0  ;;  %1446 = vmatmul.mubr.bf16.gmra.mrb[56].mxu1 %v1130_v26  ;;  %v1034_v39 = vmax.f32 %v806_v29, 0.0 }
 0x17b   :  { %v812_v38 = vadd.f32 %v811_v37, %v3260_v41  ;;  %v1035_v43 = vmax.f32 %v808_v32, 0.0 }
 0x17c   :  { %v1036_v42 = vmax.f32 %v810_v36, 0.0 }
 0x17d   :  { %v1037_v44 = vmax.f32 %v812_v38, 0.0 }
 0x17e   :  { %v1132_v45 = vpack.c.bf16 %v1036_v42, %v1034_v39 }
 0x17f   :  { %v1133_v46 = vpack.c.bf16 %v1037_v44, %v1035_v43  ;;  %v815_v47 = vpop.f32.mrb[64].mxu0 }
 0x180   :  { %v816_v48 = vadd.f32 %v815_v47, %v3258_v40  ;;  %v817_v49 = vpop.f32.mrb[65].mxu0 }
 0x181   :  { %1453 = vmatprep.mubr.bf16.mxu1 %v1133_v46  ;;  %v818_v50 = vadd.f32 %v817_v49, %v3260_v41  ;;  %v819_v51 = vpop.f32.mrb[66].mxu0 }
 0x182   :  { %1454 = vmatmul.mubr.bf16.gmra.mrb[60].mxu1 %v1132_v45  ;;  %v820_v52 = vadd.f32 %v819_v51, %v3258_v40  ;;  %v821_v53 = vpop.f32.mrb[67].mxu0  ;;  %v1038_v55 = vmax.f32 %v816_v48, 0.0 }
 0x183   :  { %v822_v54 = vadd.f32 %v821_v53, %v3260_v41  ;;  %v1039_v57 = vmax.f32 %v818_v50, 0.0 }
 0x184   :  { %v1040_v56 = vmax.f32 %v820_v52, 0.0 }
 0x185   :  { %v1041_v58 = vmax.f32 %v822_v54, 0.0 }
 0x186   :  { %v1134_v59 = vpack.c.bf16 %v1040_v56, %v1038_v55 }
 0x187   :  { %v1135_v60 = vpack.c.bf16 %v1041_v58, %v1039_v57  ;;  %v825_v61 = vpop.f32.mrb[68].mxu0 }
 0x188   :  { %v826_v62 = vadd.f32 %v825_v61, %v3258_v40  ;;  %v827_v63 = vpop.f32.mrb[69].mxu0 }
 0x189   :  { %v828_v0 = vadd.f32 %v827_v63, %v3260_v41  ;;  %v829_v1 = vpop.f32.mrb[70].mxu0  ;;  %1461 = vmatprep.mubr.bf16.mxu1 %v1135_v60 }
 0x18a   :  { %v830_v2 = vadd.f32 %v829_v1, %v3258_v40  ;;  %v831_v3 = vpop.f32.mrb[71].mxu0  ;;  %1462 = vmatmul.mubr.bf16.gmra.mrb[64].mxu1 %v1134_v59  ;;  %v1042_v5 = vmax.f32 %v826_v62, 0.0 }
 0x18b   :  { %v832_v4 = vadd.f32 %v831_v3, %v3260_v41  ;;  %v1043_v7 = vmax.f32 %v828_v0, 0.0 }
 0x18c   :  { %v1044_v6 = vmax.f32 %v830_v2, 0.0 }
 0x18d   :  { %v1045_v8 = vmax.f32 %v832_v4, 0.0 }
 0x18e   :  { %v1136_v9 = vpack.c.bf16 %v1044_v6, %v1042_v5 }
 0x18f   :  { %v1137_v10 = vpack.c.bf16 %v1045_v8, %v1043_v7  ;;  %v835_v11 = vpop.f32.mrb[72].mxu0 }
 0x190   :  { %v836_v12 = vadd.f32 %v835_v11, %v3258_v40  ;;  %v837_v13 = vpop.f32.mrb[73].mxu0 }
 0x191   :  { %v838_v14 = vadd.f32 %v837_v13, %v3260_v41  ;;  %v839_v15 = vpop.f32.mrb[74].mxu0  ;;  %1469 = vmatprep.mubr.bf16.mxu1 %v1137_v10 }
 0x192   :  { %v840_v16 = vadd.f32 %v839_v15, %v3258_v40  ;;  %v841_v17 = vpop.f32.mrb[75].mxu0  ;;  %1470 = vmatmul.mubr.bf16.gmra.mrb[68].mxu1 %v1136_v9  ;;  %v1046_v19 = vmax.f32 %v836_v12, 0.0 }
 0x193   :  { %v842_v18 = vadd.f32 %v841_v17, %v3260_v41  ;;  %v1047_v21 = vmax.f32 %v838_v14, 0.0 }
 0x194   :  { %v1048_v20 = vmax.f32 %v840_v16, 0.0 }
 0x195   :  { %v1049_v22 = vmax.f32 %v842_v18, 0.0 }
 0x196   :  { %v1138_v23 = vpack.c.bf16 %v1048_v20, %v1046_v19 }
 0x197   :  { %v1139_v24 = vpack.c.bf16 %v1049_v22, %v1047_v21  ;;  %v845_v25 = vpop.f32.mrb[76].mxu0 }
 0x198   :  { %v846_v26 = vadd.f32 %v845_v25, %v3258_v40  ;;  %v847_v27 = vpop.f32.mrb[77].mxu0 }
 0x199   :  { %v848_v28 = vadd.f32 %v847_v27, %v3260_v41  ;;  %v849_v29 = vpop.f32.mrb[78].mxu0  ;;  %1477 = vmatprep.mubr.bf16.mxu1 %v1139_v24 }
 0x19a   :  { %v850_v30 = vadd.f32 %v849_v29, %v3258_v40  ;;  %v851_v32 = vpop.f32.mrb[79].mxu0  ;;  %1478 = vmatmul.mubr.bf16.gmra.mrb[72].mxu1 %v1138_v23  ;;  %v1050_v36 = vmax.f32 %v846_v26, 0.0 }
 0x19b   :  { %v852_v33 = vadd.f32 %v851_v32, %v3260_v41  ;;  %v1051_v38 = vmax.f32 %v848_v28, 0.0 }
 0x19c   :  { %v1052_v37 = vmax.f32 %v850_v30, 0.0 }
 0x19d   :  { %v1053_v39 = vmax.f32 %v852_v33, 0.0 }
 0x19e   :  { %v1140_v42 = vpack.c.bf16 %v1052_v37, %v1050_v36 }
 0x19f   :  { %v1141_v43 = vpack.c.bf16 %v1053_v39, %v1051_v38  ;;  %v855_v44 = vpop.f32.mrb[80].mxu0 }
 0x1a0   :  { %v856_v45 = vadd.f32 %v855_v44, %v3258_v40  ;;  %v857_v46 = vpop.f32.mrb[81].mxu0 }
 0x1a1   :  { %v858_v47 = vadd.f32 %v857_v46, %v3260_v41  ;;  %v859_v48 = vpop.f32.mrb[82].mxu0  ;;  %1485 = vmatprep.mubr.bf16.mxu1 %v1141_v43 }
 0x1a2   :  { %v860_v49 = vadd.f32 %v859_v48, %v3258_v40  ;;  %v861_v50 = vpop.f32.mrb[83].mxu0  ;;  %1486 = vmatmul.mubr.bf16.gmra.mrb[76].mxu1 %v1140_v42  ;;  %v1054_v52 = vmax.f32 %v856_v45, 0.0 }
 0x1a3   :  { %v862_v51 = vadd.f32 %v861_v50, %v3260_v41  ;;  %v1055_v54 = vmax.f32 %v858_v47, 0.0 }
 0x1a4   :  { %v1056_v53 = vmax.f32 %v860_v49, 0.0 }
 0x1a5   :  { %v1057_v55 = vmax.f32 %v862_v51, 0.0 }
 0x1a6   :  { %v1142_v56 = vpack.c.bf16 %v1056_v53, %v1054_v52 }
 0x1a7   :  { %v1143_v57 = vpack.c.bf16 %v1057_v55, %v1055_v54  ;;  %v865_v58 = vpop.f32.mrb[84].mxu0 }
 0x1a8   :  { %v866_v59 = vadd.f32 %v865_v58, %v3258_v40  ;;  %v867_v60 = vpop.f32.mrb[85].mxu0 }
 0x1a9   :  { %v868_v61 = vadd.f32 %v867_v60, %v3260_v41  ;;  %v869_v62 = vpop.f32.mrb[86].mxu0  ;;  %1493 = vmatprep.mubr.bf16.mxu1 %v1143_v57 }
 0x1aa   :  { %v870_v63 = vadd.f32 %v869_v62, %v3258_v40  ;;  %v871_v0 = vpop.f32.mrb[87].mxu0  ;;  %1494 = vmatmul.mubr.bf16.gmra.mrb[80].mxu1 %v1142_v56  ;;  %v1058_v2 = vmax.f32 %v866_v59, 0.0 }
 0x1ab   :  { %v872_v1 = vadd.f32 %v871_v0, %v3260_v41  ;;  %v1059_v4 = vmax.f32 %v868_v61, 0.0 }
 0x1ac   :  { %v1060_v3 = vmax.f32 %v870_v63, 0.0 }
 0x1ad   :  { %v1061_v5 = vmax.f32 %v872_v1, 0.0 }
 0x1ae   :  { %v1144_v6 = vpack.c.bf16 %v1060_v3, %v1058_v2 }
 0x1af   :  { %v1145_v7 = vpack.c.bf16 %v1061_v5, %v1059_v4  ;;  %v875_v8 = vpop.f32.mrb[88].mxu0 }
 0x1b0   :  { %v876_v9 = vadd.f32 %v875_v8, %v3258_v40  ;;  %v877_v10 = vpop.f32.mrb[89].mxu0 }
 0x1b1   :  { %v878_v11 = vadd.f32 %v877_v10, %v3260_v41  ;;  %v879_v12 = vpop.f32.mrb[90].mxu0  ;;  %1501 = vmatprep.mubr.bf16.mxu1 %v1145_v7 }
 0x1b2   :  { %v880_v13 = vadd.f32 %v879_v12, %v3258_v40  ;;  %v881_v14 = vpop.f32.mrb[91].mxu0  ;;  %1502 = vmatmul.mubr.bf16.gmra.mrb[84].mxu1 %v1144_v6  ;;  %v1062_v16 = vmax.f32 %v876_v9, 0.0 }
 0x1b3   :  { %v882_v15 = vadd.f32 %v881_v14, %v3260_v41  ;;  %v1063_v18 = vmax.f32 %v878_v11, 0.0 }
 0x1b4   :  { %v1064_v17 = vmax.f32 %v880_v13, 0.0 }
 0x1b5   :  { %v1065_v19 = vmax.f32 %v882_v15, 0.0 }
 0x1b6   :  { %v1146_v20 = vpack.c.bf16 %v1064_v17, %v1062_v16 }
 0x1b7   :  { %v1147_v21 = vpack.c.bf16 %v1065_v19, %v1063_v18  ;;  %v885_v22 = vpop.f32.mrb[92].mxu0 }
 0x1b8   :  { %v886_v23 = vadd.f32 %v885_v22, %v3258_v40  ;;  %v887_v24 = vpop.f32.mrb[93].mxu0 }
 0x1b9   :  { %v888_v25 = vadd.f32 %v887_v24, %v3260_v41  ;;  %v889_v26 = vpop.f32.mrb[94].mxu0  ;;  %1509 = vmatprep.mubr.bf16.mxu1 %v1147_v21 }
 0x1ba   :  { %v890_v27 = vadd.f32 %v889_v26, %v3258_v40  ;;  %v891_v28 = vpop.f32.mrb[95].mxu0  ;;  %1510 = vmatmul.mubr.bf16.gmra.mrb[88].mxu1 %v1146_v20  ;;  %v1066_v30 = vmax.f32 %v886_v23, 0.0  ;;  %v3432_v26 = vld [vmem:[%s3694_s4] ss:$0 sm:$0xff] }
 0x1bb   :  { %v892_v29 = vadd.f32 %v891_v28, %v3260_v41  ;;  %v1067_v33 = vmax.f32 %v888_v25, 0.0 }
 0x1bc   :  { %v1068_v32 = vmax.f32 %v890_v27, 0.0 }
 0x1bd   :  { %v1069_v36 = vmax.f32 %v892_v29, 0.0 }
 0x1be   :  { %v1148_v37 = vpack.c.bf16 %v1068_v32, %v1066_v30 }
 0x1bf   :  { %v1149_v38 = vpack.c.bf16 %v1069_v36, %v1067_v33  ;;  %v895_v39 = vpop.f32.mrb[96].mxu0 }
 0x1c0   :  { %v896_v42 = vadd.f32 %v895_v39, %v3258_v40  ;;  %v897_v43 = vpop.f32.mrb[97].mxu0 }
 0x1c1   :  { %v898_v44 = vadd.f32 %v897_v43, %v3260_v41  ;;  %v899_v45 = vpop.f32.mrb[98].mxu0  ;;  %1517 = vmatprep.mubr.bf16.mxu1 %v1149_v38 }
 0x1c2   :  { %v900_v46 = vadd.f32 %v899_v45, %v3258_v40  ;;  %v901_v47 = vpop.f32.mrb[99].mxu0  ;;  %1518 = vmatmul.mubr.bf16.gmra.mrb[92].mxu1 %v1148_v37  ;;  %v1070_v49 = vmax.f32 %v896_v42, 0.0 }
 0x1c3   :  { %v902_v48 = vadd.f32 %v901_v47, %v3260_v41  ;;  %v1071_v51 = vmax.f32 %v898_v44, 0.0 }
 0x1c4   :  { %v1072_v50 = vmax.f32 %v900_v46, 0.0 }
 0x1c5   :  { %v1073_v52 = vmax.f32 %v902_v48, 0.0 }
 0x1c6   :  { %v1150_v53 = vpack.c.bf16 %v1072_v50, %v1070_v49 }
 0x1c7   :  { %v1151_v54 = vpack.c.bf16 %v1073_v52, %v1071_v51  ;;  %v905_v55 = vpop.f32.mrb[100].mxu0 }
 0x1c8   :  { %v906_v56 = vadd.f32 %v905_v55, %v3258_v40  ;;  %v907_v57 = vpop.f32.mrb[101].mxu0 }
 0x1c9   :  { %v908_v58 = vadd.f32 %v907_v57, %v3260_v41  ;;  %v909_v59 = vpop.f32.mrb[102].mxu0  ;;  %1525 = vmatprep.mubr.bf16.mxu1 %v1151_v54 }
 0x1ca   :  { %v910_v60 = vadd.f32 %v909_v59, %v3258_v40  ;;  %v911_v61 = vpop.f32.mrb[103].mxu0  ;;  %1526 = vmatmul.mubr.bf16.gmra.mrb[96].mxu1 %v1150_v53  ;;  %v1074_v63 = vmax.f32 %v906_v56, 0.0 }
 0x1cb   :  { %v912_v62 = vadd.f32 %v911_v61, %v3260_v41  ;;  %v1075_v1 = vmax.f32 %v908_v58, 0.0 }
 0x1cc   :  { %v1076_v0 = vmax.f32 %v910_v60, 0.0 }
 0x1cd   :  { %v1077_v2 = vmax.f32 %v912_v62, 0.0 }
 0x1ce   :  { %v1152_v3 = vpack.c.bf16 %v1076_v0, %v1074_v63 }
 0x1cf   :  { %v1153_v4 = vpack.c.bf16 %v1077_v2, %v1075_v1  ;;  %v915_v5 = vpop.f32.mrb[104].mxu0 }
 0x1d0   :  { %v916_v6 = vadd.f32 %v915_v5, %v3258_v40  ;;  %v917_v7 = vpop.f32.mrb[105].mxu0 }
 0x1d1   :  { %v918_v8 = vadd.f32 %v917_v7, %v3260_v41  ;;  %v919_v9 = vpop.f32.mrb[106].mxu0  ;;  %1533 = vmatprep.mubr.bf16.mxu1 %v1153_v4 }
 0x1d2   :  { %v920_v10 = vadd.f32 %v919_v9, %v3258_v40  ;;  %v921_v11 = vpop.f32.mrb[107].mxu0  ;;  %1534 = vmatmul.mubr.bf16.gmra.mrb[100].mxu1 %v1152_v3  ;;  %v1078_v13 = vmax.f32 %v916_v6, 0.0 }
 0x1d3   :  { %v922_v12 = vadd.f32 %v921_v11, %v3260_v41  ;;  %v1079_v15 = vmax.f32 %v918_v8, 0.0 }
 0x1d4   :  { %v1080_v14 = vmax.f32 %v920_v10, 0.0 }
 0x1d5   :  { %v1081_v16 = vmax.f32 %v922_v12, 0.0 }
 0x1d6   :  { %v1154_v17 = vpack.c.bf16 %v1080_v14, %v1078_v13 }
 0x1d7   :  { %v1155_v18 = vpack.c.bf16 %v1081_v16, %v1079_v15  ;;  %v925_v19 = vpop.f32.mrb[108].mxu0 }
 0x1d8   :  { %v926_v20 = vadd.f32 %v925_v19, %v3258_v40  ;;  %v927_v21 = vpop.f32.mrb[109].mxu0 }
 0x1d9   :  { %v928_v22 = vadd.f32 %v927_v21, %v3260_v41  ;;  %v929_v23 = vpop.f32.mrb[110].mxu0  ;;  %1541 = vmatprep.mubr.bf16.mxu1 %v1155_v18 }
 0x1da   :  { %v930_v24 = vadd.f32 %v929_v23, %v3258_v40  ;;  %v931_v25 = vpop.f32.mrb[111].mxu0  ;;  %1542 = vmatmul.mubr.bf16.gmra.mrb[104].mxu1 %v1154_v17  ;;  %v1082_v28 = vmax.f32 %v926_v20, 0.0 }
 0x1db   :  { %v932_v27 = vadd.f32 %v931_v25, %v3260_v41  ;;  %v1083_v32 = vmax.f32 %v928_v22, 0.0 }
 0x1dc   :  { %v1084_v29 = vmax.f32 %v930_v24, 0.0 }
 0x1dd   :  { %v1335_v30 = vpop.f32.mrb[0].mxu1  ;;  %v1085_v33 = vmax.f32 %v932_v27, 0.0 }
 0x1de   :  { %v1336_v36 = vadd.f32 %v3432_v26, %v1335_v30  ;;  %v1337_v37 = vpop.f32.mrb[1].mxu1  ;;  %v1156_v38 = vpack.c.bf16 %v1084_v29, %v1082_v28 }
 0x1df   :  { %v1338_v39 = vpop.f32.mrb[2].mxu1  ;;  %v1157_v42 = vpack.c.bf16 %v1085_v33, %v1083_v32  ;;  %v935_v43 = vpop.f32.mrb[112].mxu0 }
 0x1e0   :  { %v1339_v44 = vadd.f32 %v3432_v26, %v1338_v39  ;;  %v1340_v45 = vpop.f32.mrb[3].mxu1  ;;  %v936_v46 = vadd.f32 %v935_v43, %v3258_v40  ;;  %v937_v47 = vpop.f32.mrb[113].mxu0  ;;  %v1590_v50 = vmax.f32 %v1336_v36, 0.0 }
 0x1e1   :  { %v938_v48 = vadd.f32 %v937_v47, %v3260_v41  ;;  %v939_v49 = vpop.f32.mrb[114].mxu0  ;;  %1549 = vmatprep.mubr.bf16.mxu1 %v1157_v42 }
 0x1e2   :  { %v1591_v51 = vmax.f32 %v1339_v44, 0.0  ;;  %v940_v52 = vadd.f32 %v939_v49, %v3258_v40  ;;  %v941_v53 = vpop.f32.mrb[115].mxu0  ;;  %1550 = vmatmul.mubr.bf16.gmra.mrb[108].mxu1 %v1156_v38  ;;  %v1086_v56 = vmax.f32 %v936_v46, 0.0 }
 0x1e3   :  { %v942_v54 = vadd.f32 %v941_v53, %v3260_v41  ;;  %v1087_v59 = vmax.f32 %v938_v48, 0.0 }
 0x1e4   :  { %v1654_v55 = vpack.c.bf16 %v1591_v51, %v1590_v50  ;;  %v1088_v57 = vmax.f32 %v940_v52, 0.0 }
 0x1e5   :  { %v1343_v58 = vpop.f32.mrb[4].mxu1  ;;  %v1089_v60 = vmax.f32 %v942_v54, 0.0 }
 0x1e6   :  { %v1344_v61 = vadd.f32 %v3432_v26, %v1343_v58  ;;  %v1345_v62 = vpop.f32.mrb[5].mxu1  ;;  %2619 = vmatprep.mubr.bf16.mxu0 %v1654_v55  ;;  %v1158_v63 = vpack.c.bf16 %v1088_v57, %v1086_v56 }
 0x1e7   :  { %v1346_v0 = vpop.f32.mrb[6].mxu1  ;;  %v1159_v1 = vpack.c.bf16 %v1089_v60, %v1087_v59  ;;  %v945_v2 = vpop.f32.mrb[116].mxu0 }
 0x1e8   :  { %v1347_v3 = vadd.f32 %v3432_v26, %v1346_v0  ;;  %v1348_v4 = vpop.f32.mrb[7].mxu1  ;;  %v946_v5 = vadd.f32 %v945_v2, %v3258_v40  ;;  %v947_v6 = vpop.f32.mrb[117].mxu0  ;;  %v1592_v9 = vmax.f32 %v1344_v61, 0.0 }
 0x1e9   :  { %v948_v7 = vadd.f32 %v947_v6, %v3260_v41  ;;  %v949_v8 = vpop.f32.mrb[118].mxu0  ;;  %1557 = vmatprep.mubr.bf16.mxu1 %v1159_v1 }
 0x1ea   :  { %v1593_v10 = vmax.f32 %v1347_v3, 0.0  ;;  %v950_v11 = vadd.f32 %v949_v8, %v3258_v40  ;;  %v951_v12 = vpop.f32.mrb[119].mxu0  ;;  %1558 = vmatmul.mubr.bf16.gmra.mrb[112].mxu1 %v1158_v63  ;;  %v1090_v15 = vmax.f32 %v946_v5, 0.0 }
 0x1eb   :  { %v952_v13 = vadd.f32 %v951_v12, %v3260_v41  ;;  %v1091_v18 = vmax.f32 %v948_v7, 0.0 }
 0x1ec   :  { %v1655_v14 = vpack.c.bf16 %v1593_v10, %v1592_v9  ;;  %v1092_v16 = vmax.f32 %v950_v11, 0.0 }
 0x1ed   :  { %v1351_v17 = vpop.f32.mrb[8].mxu1  ;;  %v1093_v19 = vmax.f32 %v952_v13, 0.0 }
 0x1ee   :  { %v1352_v20 = vadd.f32 %v3432_v26, %v1351_v17  ;;  %v1353_v21 = vpop.f32.mrb[9].mxu1  ;;  %2620 = vmatmul.mubr.bf16.vlgmr.msra.gmra.mrb[128].mxu0 %v1655_v14  ;;  %v1160_v22 = vpack.c.bf16 %v1092_v16, %v1090_v15 }
 0x1ef   :  { %v1354_v23 = vpop.f32.mrb[10].mxu1  ;;  %v1161_v24 = vpack.c.bf16 %v1093_v19, %v1091_v18  ;;  %v955_v25 = vpop.f32.mrb[120].mxu0 }
 0x1f0   :  { %v1355_v27 = vadd.f32 %v3432_v26, %v1354_v23  ;;  %v1356_v28 = vpop.f32.mrb[11].mxu1  ;;  %v956_v29 = vadd.f32 %v955_v25, %v3258_v40  ;;  %v957_v30 = vpop.f32.mrb[121].mxu0  ;;  %v1594_v36 = vmax.f32 %v1352_v20, 0.0 }
 0x1f1   :  { %v958_v32 = vadd.f32 %v957_v30, %v3260_v41  ;;  %v959_v33 = vpop.f32.mrb[122].mxu0  ;;  %1565 = vmatprep.mubr.bf16.mxu1 %v1161_v24 }
 0x1f2   :  { %v1595_v37 = vmax.f32 %v1355_v27, 0.0  ;;  %v960_v38 = vadd.f32 %v959_v33, %v3258_v40  ;;  %v961_v39 = vpop.f32.mrb[123].mxu0  ;;  %1566 = vmatmul.mubr.bf16.gmra.mrb[116].mxu1 %v1160_v22  ;;  %v1094_v44 = vmax.f32 %v956_v29, 0.0 }
 0x1f3   :  { %v962_v42 = vadd.f32 %v961_v39, %v3260_v41  ;;  %v1095_v47 = vmax.f32 %v958_v32, 0.0 }
 0x1f4   :  { %v1656_v43 = vpack.c.bf16 %v1595_v37, %v1594_v36  ;;  %v1096_v45 = vmax.f32 %v960_v38, 0.0 }
 0x1f5   :  { %v1359_v46 = vpop.f32.mrb[12].mxu1  ;;  %v1097_v48 = vmax.f32 %v962_v42, 0.0 }
 0x1f6   :  { %v1360_v49 = vadd.f32 %v3432_v26, %v1359_v46  ;;  %v1361_v50 = vpop.f32.mrb[13].mxu1  ;;  %2623 = vmatprep.mubr.bf16.mxu0 %v1656_v43  ;;  %v1162_v51 = vpack.c.bf16 %v1096_v45, %v1094_v44 }
 0x1f7   :  { %v1362_v52 = vpop.f32.mrb[14].mxu1  ;;  %v1163_v53 = vpack.c.bf16 %v1097_v48, %v1095_v47  ;;  %v965_v54 = vpop.f32.mrb[124].mxu0 }
 0x1f8   :  { %v1363_v55 = vadd.f32 %v3432_v26, %v1362_v52  ;;  %v1364_v56 = vpop.f32.mrb[15].mxu1  ;;  %v966_v57 = vadd.f32 %v965_v54, %v3258_v40  ;;  %v967_v58 = vpop.f32.mrb[125].mxu0  ;;  %v1596_v61 = vmax.f32 %v1360_v49, 0.0 }
 0x1f9   :  { %v968_v59 = vadd.f32 %v967_v58, %v3260_v41  ;;  %v969_v60 = vpop.f32.mrb[126].mxu0  ;;  %1573 = vmatprep.mubr.bf16.mxu1 %v1163_v53 }
 0x1fa   :  { %v1597_v62 = vmax.f32 %v1363_v55, 0.0  ;;  %v970_v63 = vadd.f32 %v969_v60, %v3258_v40  ;;  %v971_v0 = vpop.f32.mrb[127].mxu0  ;;  %1574 = vmatmul.mubr.bf16.gmra.mrb[120].mxu1 %v1162_v51  ;;  %v1098_v3 = vmax.f32 %v966_v57, 0.0 }
 0x1fb   :  { %v972_v1 = vadd.f32 %v971_v0, %v3260_v41  ;;  %v1099_v6 = vmax.f32 %v968_v59, 0.0 }
 0x1fc   :  { %v1657_v2 = vpack.c.bf16 %v1597_v62, %v1596_v61  ;;  %v1100_v4 = vmax.f32 %v970_v63, 0.0 }
 0x1fd   :  { %v1367_v5 = vpop.f32.mrb[16].mxu1  ;;  %v1101_v7 = vmax.f32 %v972_v1, 0.0 }
 0x1fe   :  { %v1368_v8 = vadd.f32 %v3432_v26, %v1367_v5  ;;  %v1369_v9 = vpop.f32.mrb[17].mxu1  ;;  %2624 = vmatmul.mubr.bf16.gmra.mrb[132].mxu0 %v1657_v2  ;;  %v1164_v10 = vpack.c.bf16 %v1100_v4, %v1098_v3 }
 0x1ff   :  { %v1370_v11 = vpop.f32.mrb[18].mxu1  ;;  %v1165_v12 = vpack.c.bf16 %v1101_v7, %v1099_v6 }
 0x200   :  { %v1371_v13 = vadd.f32 %v3432_v26, %v1370_v11  ;;  %v1372_v40 = vpop.f32.mrb[19].mxu1  ;;  %v1598_v14 = vmax.f32 %v1368_v8, 0.0 }
 0x201   :  { %1581 = vmatprep.mubr.bf16.mxu1 %v1165_v12 }
 0x202   :  { %v1599_v15 = vmax.f32 %v1371_v13, 0.0  ;;  %1582 = vmatmul.mubr.bf16.gmra.mrb[124].mxu1 %v1164_v10 }
 0x204   :  { %v1658_v41 = vpack.c.bf16 %v1599_v15, %v1598_v14 }
 0x205   :  { %v1375_v16 = vpop.f32.mrb[20].mxu1 }
 0x206   :  { %v1376_v17 = vadd.f32 %v3432_v26, %v1375_v16  ;;  %v1377_v18 = vpop.f32.mrb[21].mxu1  ;;  %2627 = vmatprep.mubr.bf16.mxu0 %v1658_v41 }
 0x207   :  { %v1378_v19 = vpop.f32.mrb[22].mxu1 }
 0x208   :  { %v1379_v20 = vadd.f32 %v3432_v26, %v1378_v19  ;;  %v1380_v21 = vpop.f32.mrb[23].mxu1  ;;  %v1600_v22 = vmax.f32 %v1376_v17, 0.0 }
 0x20a   :  { %v1601_v23 = vmax.f32 %v1379_v20, 0.0 }
 0x20c   :  { %v1659_v24 = vpack.c.bf16 %v1601_v23, %v1600_v22 }
 0x20d   :  { %v1383_v25 = vpop.f32.mrb[24].mxu1 }
 0x20e   :  { %v1384_v27 = vadd.f32 %v3432_v26, %v1383_v25  ;;  %v1385_v28 = vpop.f32.mrb[25].mxu1  ;;  %2628 = vmatmul.mubr.bf16.gmra.mrb[136].mxu0 %v1659_v24 }
 0x20f   :  { %v1386_v29 = vpop.f32.mrb[26].mxu1 }
 0x210   :  { %v1387_v30 = vadd.f32 %v3432_v26, %v1386_v29  ;;  %v1388_v32 = vpop.f32.mrb[27].mxu1  ;;  %v1602_v33 = vmax.f32 %v1384_v27, 0.0 }
 0x212   :  { %v1603_v36 = vmax.f32 %v1387_v30, 0.0 }
 0x214   :  { %v1660_v37 = vpack.c.bf16 %v1603_v36, %v1602_v33 }
 0x215   :  { %v1391_v38 = vpop.f32.mrb[28].mxu1 }
 0x216   :  { %v1392_v39 = vadd.f32 %v3432_v26, %v1391_v38  ;;  %v1393_v42 = vpop.f32.mrb[29].mxu1  ;;  %2631 = vmatprep.mubr.bf16.mxu0 %v1660_v37 }
 0x217   :  { %v1394_v43 = vpop.f32.mrb[30].mxu1 }
 0x218   :  { %v1395_v44 = vadd.f32 %v3432_v26, %v1394_v43  ;;  %v1396_v45 = vpop.f32.mrb[31].mxu1  ;;  %v1604_v46 = vmax.f32 %v1392_v39, 0.0 }
 0x21a   :  { %v1605_v47 = vmax.f32 %v1395_v44, 0.0 }
 0x21c   :  { %v1661_v48 = vpack.c.bf16 %v1605_v47, %v1604_v46 }
 0x21d   :  { %v1399_v49 = vpop.f32.mrb[32].mxu1 }
 0x21e   :  { %v1400_v50 = vadd.f32 %v3432_v26, %v1399_v49  ;;  %v1401_v51 = vpop.f32.mrb[33].mxu1  ;;  %2632 = vmatmul.mubr.bf16.gmra.mrb[140].mxu0 %v1661_v48 }
 0x21f   :  { %v1402_v52 = vpop.f32.mrb[34].mxu1 }
 0x220   :  { %v1403_v53 = vadd.f32 %v3432_v26, %v1402_v52  ;;  %v1404_v54 = vpop.f32.mrb[35].mxu1  ;;  %v1606_v55 = vmax.f32 %v1400_v50, 0.0 }
 0x222   :  { %v1607_v56 = vmax.f32 %v1403_v53, 0.0 }
 0x224   :  { %v1662_v57 = vpack.c.bf16 %v1607_v56, %v1606_v55 }
 0x225   :  { %v1407_v58 = vpop.f32.mrb[36].mxu1 }
 0x226   :  { %v1408_v59 = vadd.f32 %v3432_v26, %v1407_v58  ;;  %v1409_v60 = vpop.f32.mrb[37].mxu1  ;;  %2635 = vmatprep.mubr.bf16.mxu0 %v1662_v57 }
 0x227   :  { %v1410_v61 = vpop.f32.mrb[38].mxu1 }
 0x228   :  { %v1411_v62 = vadd.f32 %v3432_v26, %v1410_v61  ;;  %v1412_v63 = vpop.f32.mrb[39].mxu1  ;;  %v1608_v0 = vmax.f32 %v1408_v59, 0.0 }
 0x22a   :  { %v1609_v1 = vmax.f32 %v1411_v62, 0.0 }
 0x22c   :  { %v1663_v2 = vpack.c.bf16 %v1609_v1, %v1608_v0 }
 0x22d   :  { %v1415_v3 = vpop.f32.mrb[40].mxu1 }
 0x22e   :  { %2636 = vmatmul.mubr.bf16.gmra.mrb[144].mxu0 %v1663_v2  ;;  %v1416_v4 = vadd.f32 %v3432_v26, %v1415_v3  ;;  %v1417_v5 = vpop.f32.mrb[41].mxu1 }
 0x22f   :  { %v1418_v6 = vpop.f32.mrb[42].mxu1 }
 0x230   :  { %v1419_v7 = vadd.f32 %v3432_v26, %v1418_v6  ;;  %v1420_v8 = vpop.f32.mrb[43].mxu1  ;;  %v1610_v9 = vmax.f32 %v1416_v4, 0.0 }
 0x232   :  { %v1611_v10 = vmax.f32 %v1419_v7, 0.0 }
 0x234   :  { %v1664_v11 = vpack.c.bf16 %v1611_v10, %v1610_v9 }
 0x235   :  { %v1423_v12 = vpop.f32.mrb[44].mxu1 }
 0x236   :  { %v1424_v13 = vadd.f32 %v3432_v26, %v1423_v12  ;;  %v1425_v40 = vpop.f32.mrb[45].mxu1  ;;  %2639 = vmatprep.mubr.bf16.mxu0 %v1664_v11 }
 0x237   :  { %v1426_v14 = vpop.f32.mrb[46].mxu1 }
 0x238   :  { %v1427_v15 = vadd.f32 %v3432_v26, %v1426_v14  ;;  %v1428_v41 = vpop.f32.mrb[47].mxu1  ;;  %v1612_v16 = vmax.f32 %v1424_v13, 0.0 }
 0x23a   :  { %v1613_v17 = vmax.f32 %v1427_v15, 0.0 }
 0x23c   :  { %v1665_v18 = vpack.c.bf16 %v1613_v17, %v1612_v16 }
 0x23d   :  { %v1431_v19 = vpop.f32.mrb[48].mxu1 }
 0x23e   :  { %2640 = vmatmul.mubr.bf16.gmra.mrb[148].mxu0 %v1665_v18  ;;  %v1432_v20 = vadd.f32 %v3432_v26, %v1431_v19  ;;  %v1433_v21 = vpop.f32.mrb[49].mxu1 }
 0x23f   :  { %v1434_v22 = vpop.f32.mrb[50].mxu1 }
 0x240   :  { %v1435_v23 = vadd.f32 %v3432_v26, %v1434_v22  ;;  %v1436_v24 = vpop.f32.mrb[51].mxu1  ;;  %v1614_v25 = vmax.f32 %v1432_v20, 0.0 }
 0x242   :  { %v1615_v27 = vmax.f32 %v1435_v23, 0.0 }
 0x244   :  { %v1666_v28 = vpack.c.bf16 %v1615_v27, %v1614_v25 }
 0x245   :  { %v1439_v29 = vpop.f32.mrb[52].mxu1 }
 0x246   :  { %v1440_v30 = vadd.f32 %v3432_v26, %v1439_v29  ;;  %v1441_v32 = vpop.f32.mrb[53].mxu1  ;;  %2643 = vmatprep.mubr.bf16.mxu0 %v1666_v28 }
 0x247   :  { %v1442_v33 = vpop.f32.mrb[54].mxu1 }
 0x248   :  { %v1443_v36 = vadd.f32 %v3432_v26, %v1442_v33  ;;  %v1444_v37 = vpop.f32.mrb[55].mxu1  ;;  %v1616_v38 = vmax.f32 %v1440_v30, 0.0 }
 0x24a   :  { %v1617_v39 = vmax.f32 %v1443_v36, 0.0 }
 0x24c   :  { %v1667_v42 = vpack.c.bf16 %v1617_v39, %v1616_v38 }
 0x24d   :  { %v1447_v43 = vpop.f32.mrb[56].mxu1 }
 0x24e   :  { %2644 = vmatmul.mubr.bf16.gmra.mrb[152].mxu0 %v1667_v42  ;;  %v1448_v44 = vadd.f32 %v3432_v26, %v1447_v43  ;;  %v1449_v45 = vpop.f32.mrb[57].mxu1 }
 0x24f   :  { %v1450_v46 = vpop.f32.mrb[58].mxu1 }
 0x250   :  { %v1451_v47 = vadd.f32 %v3432_v26, %v1450_v46  ;;  %v1452_v48 = vpop.f32.mrb[59].mxu1  ;;  %v1618_v49 = vmax.f32 %v1448_v44, 0.0 }
 0x252   :  { %v1619_v50 = vmax.f32 %v1451_v47, 0.0 }
 0x254   :  { %v1668_v51 = vpack.c.bf16 %v1619_v50, %v1618_v49 }
 0x255   :  { %v1455_v52 = vpop.f32.mrb[60].mxu1 }
 0x256   :  { %v1456_v53 = vadd.f32 %v3432_v26, %v1455_v52  ;;  %v1457_v54 = vpop.f32.mrb[61].mxu1  ;;  %2647 = vmatprep.mubr.bf16.mxu0 %v1668_v51 }
 0x257   :  { %v1458_v55 = vpop.f32.mrb[62].mxu1 }
 0x258   :  { %v1459_v56 = vadd.f32 %v3432_v26, %v1458_v55  ;;  %v1460_v57 = vpop.f32.mrb[63].mxu1  ;;  %v1620_v58 = vmax.f32 %v1456_v53, 0.0 }
 0x25a   :  { %v1621_v59 = vmax.f32 %v1459_v56, 0.0 }
 0x25c   :  { %v1669_v60 = vpack.c.bf16 %v1621_v59, %v1620_v58 }
 0x25d   :  { %v1463_v61 = vpop.f32.mrb[64].mxu1 }
 0x25e   :  { %2648 = vmatmul.mubr.bf16.gmra.mrb[156].mxu0 %v1669_v60  ;;  %v1464_v62 = vadd.f32 %v3432_v26, %v1463_v61  ;;  %v1465_v63 = vpop.f32.mrb[65].mxu1 }
 0x25f   :  { %v1466_v0 = vpop.f32.mrb[66].mxu1 }
 0x260   :  { %v1467_v1 = vadd.f32 %v3432_v26, %v1466_v0  ;;  %v1468_v2 = vpop.f32.mrb[67].mxu1  ;;  %v1622_v3 = vmax.f32 %v1464_v62, 0.0 }
 0x262   :  { %v1623_v4 = vmax.f32 %v1467_v1, 0.0 }
 0x264   :  { %v1670_v5 = vpack.c.bf16 %v1623_v4, %v1622_v3 }
 0x265   :  { %v1471_v6 = vpop.f32.mrb[68].mxu1 }
 0x266   :  { %v1472_v7 = vadd.f32 %v3432_v26, %v1471_v6  ;;  %v1473_v8 = vpop.f32.mrb[69].mxu1  ;;  %2651 = vmatprep.mubr.bf16.mxu0 %v1670_v5 }
 0x267   :  { %v1474_v9 = vpop.f32.mrb[70].mxu1 }
 0x268   :  { %v1475_v10 = vadd.f32 %v3432_v26, %v1474_v9  ;;  %v1476_v11 = vpop.f32.mrb[71].mxu1  ;;  %v1624_v12 = vmax.f32 %v1472_v7, 0.0 }
 0x26a   :  { %v1625_v13 = vmax.f32 %v1475_v10, 0.0 }
 0x26c   :  { %v1671_v40 = vpack.c.bf16 %v1625_v13, %v1624_v12 }
 0x26d   :  { %v1479_v14 = vpop.f32.mrb[72].mxu1 }
 0x26e   :  { %v1480_v15 = vadd.f32 %v3432_v26, %v1479_v14  ;;  %v1481_v41 = vpop.f32.mrb[73].mxu1  ;;  %2652 = vmatmul.mubr.bf16.gmra.mrb[160].mxu0 %v1671_v40 }
 0x26f   :  { %v1482_v16 = vpop.f32.mrb[74].mxu1 }
 0x270   :  { %v1483_v17 = vadd.f32 %v3432_v26, %v1482_v16  ;;  %v1484_v18 = vpop.f32.mrb[75].mxu1  ;;  %v1626_v19 = vmax.f32 %v1480_v15, 0.0 }
 0x272   :  { %v1627_v20 = vmax.f32 %v1483_v17, 0.0 }
 0x274   :  { %v1672_v21 = vpack.c.bf16 %v1627_v20, %v1626_v19 }
 0x275   :  { %v1487_v22 = vpop.f32.mrb[76].mxu1 }
 0x276   :  { %v1488_v23 = vadd.f32 %v3432_v26, %v1487_v22  ;;  %v1489_v24 = vpop.f32.mrb[77].mxu1  ;;  %2655 = vmatprep.mubr.bf16.mxu0 %v1672_v21 }
 0x277   :  { %v1490_v25 = vpop.f32.mrb[78].mxu1 }
 0x278   :  { %v1491_v27 = vadd.f32 %v3432_v26, %v1490_v25  ;;  %v1492_v28 = vpop.f32.mrb[79].mxu1  ;;  %v1628_v29 = vmax.f32 %v1488_v23, 0.0 }
 0x27a   :  { %v1629_v30 = vmax.f32 %v1491_v27, 0.0 }
 0x27c   :  { %v1673_v32 = vpack.c.bf16 %v1629_v30, %v1628_v29 }
 0x27d   :  { %v1495_v33 = vpop.f32.mrb[80].mxu1 }
 0x27e   :  { %v1496_v36 = vadd.f32 %v3432_v26, %v1495_v33  ;;  %v1497_v37 = vpop.f32.mrb[81].mxu1  ;;  %2656 = vmatmul.mubr.bf16.gmra.mrb[164].mxu0 %v1673_v32 }
 0x27f   :  { %v1498_v38 = vpop.f32.mrb[82].mxu1 }
 0x280   :  { %v1499_v39 = vadd.f32 %v3432_v26, %v1498_v38  ;;  %v1500_v42 = vpop.f32.mrb[83].mxu1  ;;  %v1630_v43 = vmax.f32 %v1496_v36, 0.0 }
 0x282   :  { %v1631_v44 = vmax.f32 %v1499_v39, 0.0 }
 0x284   :  { %v1674_v45 = vpack.c.bf16 %v1631_v44, %v1630_v43 }
 0x285   :  { %v1503_v46 = vpop.f32.mrb[84].mxu1 }
 0x286   :  { %v1504_v47 = vadd.f32 %v3432_v26, %v1503_v46  ;;  %v1505_v48 = vpop.f32.mrb[85].mxu1  ;;  %2659 = vmatprep.mubr.bf16.mxu0 %v1674_v45 }
 0x287   :  { %v1506_v49 = vpop.f32.mrb[86].mxu1 }
 0x288   :  { %v1507_v50 = vadd.f32 %v3432_v26, %v1506_v49  ;;  %v1508_v51 = vpop.f32.mrb[87].mxu1  ;;  %v1632_v52 = vmax.f32 %v1504_v47, 0.0 }
 0x28a   :  { %v1633_v53 = vmax.f32 %v1507_v50, 0.0 }
 0x28c   :  { %v1675_v54 = vpack.c.bf16 %v1633_v53, %v1632_v52  ;;  %v3511_v52 = vld [vmem:[%s3696_s6] ss:$0 sm:$0xff] }
 0x28d   :  { %v1511_v55 = vpop.f32.mrb[88].mxu1 }
 0x28e   :  { %v1512_v56 = vadd.f32 %v3432_v26, %v1511_v55  ;;  %v1513_v57 = vpop.f32.mrb[89].mxu1  ;;  %2660 = vmatmul.mubr.bf16.gmra.mrb[168].mxu0 %v1675_v54 }
 0x28f   :  { %v1514_v58 = vpop.f32.mrb[90].mxu1 }
 0x290   :  { %v1515_v59 = vadd.f32 %v3432_v26, %v1514_v58  ;;  %v1516_v60 = vpop.f32.mrb[91].mxu1  ;;  %v1634_v61 = vmax.f32 %v1512_v56, 0.0 }
 0x292   :  { %v1635_v62 = vmax.f32 %v1515_v59, 0.0 }
 0x294   :  { %v1676_v63 = vpack.c.bf16 %v1635_v62, %v1634_v61 }
 0x295   :  { %v1519_v0 = vpop.f32.mrb[92].mxu1 }
 0x296   :  { %v1520_v1 = vadd.f32 %v3432_v26, %v1519_v0  ;;  %v1521_v2 = vpop.f32.mrb[93].mxu1  ;;  %2663 = vmatprep.mubr.bf16.mxu0 %v1676_v63 }
 0x297   :  { %v1522_v3 = vpop.f32.mrb[94].mxu1 }
 0x298   :  { %v1523_v4 = vadd.f32 %v3432_v26, %v1522_v3  ;;  %v1524_v5 = vpop.f32.mrb[95].mxu1  ;;  %v1636_v6 = vmax.f32 %v1520_v1, 0.0 }
 0x29a   :  { %v1637_v7 = vmax.f32 %v1523_v4, 0.0 }
 0x29c   :  { %v1677_v8 = vpack.c.bf16 %v1637_v7, %v1636_v6 }
 0x29d   :  { %v1527_v9 = vpop.f32.mrb[96].mxu1 }
 0x29e   :  { %v1528_v10 = vadd.f32 %v3432_v26, %v1527_v9  ;;  %v1529_v11 = vpop.f32.mrb[97].mxu1  ;;  %2664 = vmatmul.mubr.bf16.gmra.mrb[172].mxu0 %v1677_v8 }
 0x29f   :  { %v1530_v12 = vpop.f32.mrb[98].mxu1 }
 0x2a0   :  { %v1531_v13 = vadd.f32 %v3432_v26, %v1530_v12  ;;  %v1532_v40 = vpop.f32.mrb[99].mxu1  ;;  %v1638_v14 = vmax.f32 %v1528_v10, 0.0 }
 0x2a2   :  { %v1639_v15 = vmax.f32 %v1531_v13, 0.0 }
 0x2a4   :  { %v1678_v41 = vpack.c.bf16 %v1639_v15, %v1638_v14 }
 0x2a5   :  { %v1535_v16 = vpop.f32.mrb[100].mxu1 }
 0x2a6   :  { %v1536_v17 = vadd.f32 %v3432_v26, %v1535_v16  ;;  %v1537_v18 = vpop.f32.mrb[101].mxu1  ;;  %2667 = vmatprep.mubr.bf16.mxu0 %v1678_v41 }
 0x2a7   :  { %v1538_v19 = vpop.f32.mrb[102].mxu1 }
 0x2a8   :  { %v1539_v20 = vadd.f32 %v3432_v26, %v1538_v19  ;;  %v1540_v21 = vpop.f32.mrb[103].mxu1  ;;  %v1640_v22 = vmax.f32 %v1536_v17, 0.0 }
 0x2aa   :  { %v1641_v23 = vmax.f32 %v1539_v20, 0.0 }
 0x2ac   :  { %v1679_v24 = vpack.c.bf16 %v1641_v23, %v1640_v22 }
 0x2ad   :  { %v1543_v25 = vpop.f32.mrb[104].mxu1 }
 0x2ae   :  { %2668 = vmatmul.mubr.bf16.gmra.mrb[176].mxu0 %v1679_v24  ;;  %v1544_v27 = vadd.f32 %v3432_v26, %v1543_v25  ;;  %v1545_v28 = vpop.f32.mrb[105].mxu1 }
 0x2af   :  { %v1546_v29 = vpop.f32.mrb[106].mxu1 }
 0x2b0   :  { %v1547_v30 = vadd.f32 %v3432_v26, %v1546_v29  ;;  %v1548_v32 = vpop.f32.mrb[107].mxu1  ;;  %v1642_v33 = vmax.f32 %v1544_v27, 0.0 }
 0x2b2   :  { %v1643_v36 = vmax.f32 %v1547_v30, 0.0 }
 0x2b4   :  { %v1680_v37 = vpack.c.bf16 %v1643_v36, %v1642_v33 }
 0x2b5   :  { %v1551_v38 = vpop.f32.mrb[108].mxu1 }
 0x2b6   :  { %v1552_v39 = vadd.f32 %v3432_v26, %v1551_v38  ;;  %v1553_v42 = vpop.f32.mrb[109].mxu1  ;;  %2671 = vmatprep.mubr.bf16.mxu0 %v1680_v37 }
 0x2b7   :  { %v1554_v43 = vpop.f32.mrb[110].mxu1 }
 0x2b8   :  { %v1555_v44 = vadd.f32 %v3432_v26, %v1554_v43  ;;  %v1556_v45 = vpop.f32.mrb[111].mxu1  ;;  %v1644_v46 = vmax.f32 %v1552_v39, 0.0 }
 0x2ba   :  { %v1645_v47 = vmax.f32 %v1555_v44, 0.0 }
 0x2bc   :  { %v1681_v48 = vpack.c.bf16 %v1645_v47, %v1644_v46 }
 0x2bd   :  { %v1559_v49 = vpop.f32.mrb[112].mxu1 }
 0x2be   :  { %2672 = vmatmul.mubr.bf16.gmra.mrb[180].mxu0 %v1681_v48  ;;  %v1560_v50 = vadd.f32 %v3432_v26, %v1559_v49  ;;  %v1561_v51 = vpop.f32.mrb[113].mxu1 }
 0x2bf   :  { %v1562_v53 = vpop.f32.mrb[114].mxu1 }
 0x2c0   :  { %v1563_v54 = vadd.f32 %v3432_v26, %v1562_v53  ;;  %v1564_v55 = vpop.f32.mrb[115].mxu1  ;;  %v1646_v59 = vmax.f32 %v1560_v50, 0.0 }
 0x2c1   :  { %v2621_v56 = vpop.f32.mrb[128].mxu0 }
 0x2c2   :  { %v1800_v57 = vadd.f32 %v2621_v56, %v3511_v52  ;;  %v1791_v58 = vpop.f32.mrb[129].mxu0  ;;  %v1647_v60 = vmax.f32 %v1563_v54, 0.0 }
 0x2c3   :  { %v1792_v61 = vadd.f32 %v3511_v52, %v1791_v58  ;;  %v2622_v62 = vpop.f32.mrb[130].mxu0 }
 0x2c4   :  { %v1803_v63 = vadd.f32 %v2622_v62, %v3511_v52  ;;  %v1794_v0 = vpop.f32.mrb[131].mxu0  ;;  %v1682_v1 = vpack.c.bf16 %v1647_v60, %v1646_v59  ;;  %v2048_v4 = vmax.f32 %v1800_v57, 0.0 }
 0x2c5   :  { %v1795_v2 = vadd.f32 %v3511_v52, %v1794_v0  ;;  %v1567_v3 = vpop.f32.mrb[116].mxu1  ;;  %v2046_v8 = vmax.f32 %v1792_v61, 0.0 }
 0x2c6   :  { %v2049_v5 = vmax.f32 %v1803_v63, 0.0  ;;  %v1568_v6 = vadd.f32 %v3432_v26, %v1567_v3  ;;  %v1569_v7 = vpop.f32.mrb[117].mxu1  ;;  %2675 = vmatprep.mubr.bf16.mxu0 %v1682_v1 }
 0x2c7   :  { %v2047_v9 = vmax.f32 %v1795_v2, 0.0  ;;  %v1570_v10 = vpop.f32.mrb[118].mxu1 }
 0x2c8   :  { %v3519_v11 = vpack.c.bf16 %v2049_v5, %v2048_v4  ;;  %v1571_v12 = vadd.f32 %v3432_v26, %v1570_v10  ;;  %v1572_v13 = vpop.f32.mrb[119].mxu1  ;;  %v1648_v14 = vmax.f32 %v1568_v6, 0.0 }
 0x2c9   :  { %v3522_v40 = vpack.c.bf16 %v2047_v9, %v2046_v8 }
 0x2ca   :  { %v1649_v15 = vmax.f32 %v1571_v12, 0.0 }
 0x2cc   :  { %v1683_v41 = vpack.c.bf16 %v1649_v15, %v1648_v14 }
 0x2cd   :  { %v1575_v16 = vpop.f32.mrb[120].mxu1 }
 0x2ce   :  { %2676 = vmatmul.mubr.bf16.gmra.mrb[184].mxu0 %v1683_v41  ;;  %v1576_v17 = vadd.f32 %v3432_v26, %v1575_v16  ;;  %v1577_v18 = vpop.f32.mrb[121].mxu1 }
 0x2cf   :  { %v1578_v19 = vpop.f32.mrb[122].mxu1 }
 0x2d0   :  { %v1579_v20 = vadd.f32 %v3432_v26, %v1578_v19  ;;  %v1580_v21 = vpop.f32.mrb[123].mxu1  ;;  %v1650_v25 = vmax.f32 %v1576_v17, 0.0 }
 0x2d1   :  { %v2625_v22 = vpop.f32.mrb[132].mxu0 }
 0x2d2   :  { %v1816_v23 = vadd.f32 %v2625_v22, %v3511_v52  ;;  %v1807_v24 = vpop.f32.mrb[133].mxu0  ;;  %v1651_v27 = vmax.f32 %v1579_v20, 0.0 }
 0x2d3   :  { %v1808_v28 = vadd.f32 %v3511_v52, %v1807_v24  ;;  %v2626_v29 = vpop.f32.mrb[134].mxu0 }
 0x2d4   :  { %v1819_v30 = vadd.f32 %v2626_v29, %v3511_v52  ;;  %v1810_v32 = vpop.f32.mrb[135].mxu0  ;;  %v1684_v33 = vpack.c.bf16 %v1651_v27, %v1650_v25  ;;  %v2052_v38 = vmax.f32 %v1816_v23, 0.0 }
 0x2d5   :  { %v1811_v36 = vadd.f32 %v3511_v52, %v1810_v32  ;;  %v1583_v37 = vpop.f32.mrb[124].mxu1  ;;  %v2050_v44 = vmax.f32 %v1808_v28, 0.0  ;;  %v3559_v32 = vld [vmem:[%s3697_s7] sm:$0x1]  ;;  %s2880_s7 = smov [#allocation3]  }
 0x2d6   :  { %v2053_v39 = vmax.f32 %v1819_v30, 0.0  ;;  %v1584_v42 = vadd.f32 %v3432_v26, %v1583_v37  ;;  %v1585_v43 = vpop.f32.mrb[125].mxu1  ;;  %2679 = vmatprep.mubr.bf16.mxu0 %v1684_v33  ;;  %2583 = vmatprep.mubr.msk.bf16.mxu1 %vm2153_vm3, %v3559_v32  ;;  %v2158_v37 = vsel %vm2153_vm3, %v3522_v40, 0  ;;  %s2375_s17 = sshll.u32 %s2880_s7, 4  ;;  %s2376_s17 = int_to_ptr.vmem [resolvable:$true] %s2375_s17 }
 0x2d7   :  { %v2051_v45 = vmax.f32 %v1811_v36, 0.0  ;;  %v1586_v46 = vpop.f32.mrb[126].mxu1  ;;  %s2853_s18 = scalar_lea.vmem %s2376_s17, 64  ;;  %p2858_p1 = scmp.lt.s32.totalorder %s2376_s17, %s2376_s17 }
 0x2d8   :  { %v3531_v47 = vpack.c.bf16 %v2053_v39, %v2052_v38  ;;  %v1587_v48 = vadd.f32 %v3432_v26, %v1586_v46  ;;  %v1588_v49 = vpop.f32.mrb[127].mxu1  ;;  %v1652_v51 = vmax.f32 %v1584_v42, 0.0  ;;  %p2854_p0 = scmp.ne.s32.totalorder %s2376_s17, %s2853_s18  ;;  %p2859_p2 = scmp.lt.s32.totalorder %s2853_s18, %s2853_s18 }
 0x2d9   :  { %v3534_v50 = vpack.c.bf16 %v2051_v45, %v2050_v44  ;;  %v2161_v45 = vsel %vm2153_vm3, %v3519_v11, 0 }
 0x2da   :  { %v1653_v53 = vmax.f32 %v1587_v48, 0.0  ;;  %p2860_p3 = por %p2859_p2, %p2858_p1 }
 0x2dc   :  { %v1685_v54 = vpack.c.bf16 %v1653_v53, %v1652_v51  ;;  %p2861_p4 = pnand %p2860_p3, %p2854_p0 }
 0x2de   :  { %2680 = vmatmul.mubr.bf16.gmra.mrb[188].mxu0 %v1685_v54 }
 0x2e1   :  { %v2629_v55 = vpop.f32.mrb[136].mxu0 }
 0x2e2   :  { %v1832_v56 = vadd.f32 %v2629_v55, %v3511_v52  ;;  %v1823_v57 = vpop.f32.mrb[137].mxu0 }
 0x2e3   :  { %v1824_v58 = vadd.f32 %v3511_v52, %v1823_v57  ;;  %v2630_v59 = vpop.f32.mrb[138].mxu0  ;;  %v2164_v57 = vsel %vm2153_vm3, %v3534_v50, 0 }
 0x2e4   :  { %v1835_v60 = vadd.f32 %v2630_v59, %v3511_v52  ;;  %v1826_v61 = vpop.f32.mrb[139].mxu0  ;;  %v2056_v26 = vmax.f32 %v1832_v56, 0.0 }
 0x2e5   :  { %v1827_v62 = vadd.f32 %v3511_v52, %v1826_v61  ;;  %v2054_v0 = vmax.f32 %v1824_v58, 0.0 }
 0x2e6   :  { %v2057_v63 = vmax.f32 %v1835_v60, 0.0 }
 0x2e7   :  { %v2055_v1 = vmax.f32 %v1827_v62, 0.0  ;;  %v2167_v62 = vsel %vm2153_vm3, %v3531_v47, 0 }
 0x2e8   :  { %v3540_v2 = vpack.c.bf16 %v2057_v63, %v2056_v26 }
 0x2e9   :  { %v3542_v3 = vpack.c.bf16 %v2055_v1, %v2054_v0 }
 0x2f1   :  { %v2633_v4 = vpop.f32.mrb[140].mxu0 }
 0x2f2   :  { %v1848_v5 = vadd.f32 %v2633_v4, %v3511_v52  ;;  %v1839_v6 = vpop.f32.mrb[141].mxu0 }
 0x2f3   :  { %v1840_v7 = vadd.f32 %v3511_v52, %v1839_v6  ;;  %v2634_v8 = vpop.f32.mrb[142].mxu0 }
 0x2f4   :  { %v1851_v9 = vadd.f32 %v2634_v8, %v3511_v52  ;;  %v1842_v10 = vpop.f32.mrb[143].mxu0  ;;  %v2060_v13 = vmax.f32 %v1848_v5, 0.0  ;;  %v2170_v8 = vsel %vm2153_vm3, %v3542_v3, 0 }
 0x2f5   :  { %v1843_v12 = vadd.f32 %v3511_v52, %v1842_v10  ;;  %v2058_v15 = vmax.f32 %v1840_v7, 0.0 }
 0x2f6   :  { %v2061_v14 = vmax.f32 %v1851_v9, 0.0 }
 0x2f7   :  { %v2059_v41 = vmax.f32 %v1843_v12, 0.0 }
 0x2f8   :  { %v3548_v16 = vpack.c.bf16 %v2061_v14, %v2060_v13  ;;  %v2173_v14 = vsel %vm2153_vm3, %v3540_v2, 0 }
 0x2f9   :  { %v3550_v17 = vpack.c.bf16 %v2059_v41, %v2058_v15 }
 0x301   :  { %v2637_v18 = vpop.f32.mrb[144].mxu0 }
 0x302   :  { %v1864_v19 = vadd.f32 %v2637_v18, %v3511_v52  ;;  %v1855_v20 = vpop.f32.mrb[145].mxu0 }
 0x303   :  { %v1856_v21 = vadd.f32 %v3511_v52, %v1855_v20  ;;  %v2638_v22 = vpop.f32.mrb[146].mxu0 }
 0x304   :  { %v1867_v23 = vadd.f32 %v2638_v22, %v3511_v52  ;;  %v1858_v24 = vpop.f32.mrb[147].mxu0  ;;  %v2064_v27 = vmax.f32 %v1864_v19, 0.0 }
 0x305   :  { %v1859_v25 = vadd.f32 %v3511_v52, %v1858_v24  ;;  %v2062_v29 = vmax.f32 %v1856_v21, 0.0  ;;  %v2176_v24 = vsel %vm2153_vm3, %v3550_v17, 0 }
 0x306   :  { %v2065_v28 = vmax.f32 %v1867_v23, 0.0 }
 0x307   :  { %v2063_v30 = vmax.f32 %v1859_v25, 0.0 }
 0x308   :  { %v2120_v33 = vpack.c.bf16 %v2065_v28, %v2064_v27  ;;  %v2179_v28 = vsel %vm2153_vm3, %v3548_v16, 0  ;;  %v2143_v16 = vld [vmem:[#allocation2] sm:$0x1] }
 0x309   :  { %v2119_v36 = vpack.c.bf16 %v2063_v30, %v2062_v29  ;;  %2146 = vperm.xlu0 %2703, %v2143_v16  }
 0x30b   :  { %2683 = vmatprep.subr.msk.bf16.mxu1 %vm2153_vm3, %v2119_v36 }
 0x30c   :  { %2568 = vmatpush3.bf16.xpose.msra.mxu1 %v2158_v37 }
 0x30d   :  { %2684 = vmatprep.subr.msk.bf16.mxu1 %vm2153_vm3, %v2120_v33 }
 0x311   :  { %v2641_v38 = vpop.f32.mrb[148].mxu0 }
 0x312   :  { %v1880_v39 = vadd.f32 %v2641_v38, %v3511_v52  ;;  %v1871_v42 = vpop.f32.mrb[149].mxu0 }
 0x313   :  { %v1872_v43 = vadd.f32 %v3511_v52, %v1871_v42  ;;  %v2642_v44 = vpop.f32.mrb[150].mxu0 }
 0x314   :  { %v1883_v46 = vadd.f32 %v2642_v44, %v3511_v52  ;;  %v1874_v48 = vpop.f32.mrb[151].mxu0  ;;  %2570 = vmatpush3.bf16.xpose.msra.mxu1 %v2161_v45  ;;  %v2068_v40 = vmax.f32 %v1880_v39, 0.0 }
 0x315   :  { %v1875_v49 = vadd.f32 %v3511_v52, %v1874_v48  ;;  %v2066_v53 = vmax.f32 %v1872_v43, 0.0 }
 0x316   :  { %v2069_v51 = vmax.f32 %v1883_v46, 0.0 }
 0x317   :  { %v2067_v54 = vmax.f32 %v1875_v49, 0.0 }
 0x318   :  { %v2122_v55 = vpack.c.bf16 %v2069_v51, %v2068_v40 }
 0x319   :  { %v2121_v56 = vpack.c.bf16 %v2067_v54, %v2066_v53 }
 0x31b   :  { %2685 = vmatprep.subr.msk.bf16.mxu1 %vm2153_vm3, %v2121_v56 }
 0x31c   :  { %2572 = vmatpush3.bf16.xpose.msra.mxu1 %v2164_v57 }
 0x31d   :  { %2686 = vmatprep.subr.msk.bf16.mxu1 %vm2153_vm3, %v2122_v55 }
 0x321   :  { %v2645_v11 = vpop.f32.mrb[152].mxu0 }
 0x322   :  { %v1896_v58 = vadd.f32 %v2645_v11, %v3511_v52  ;;  %v1887_v59 = vpop.f32.mrb[153].mxu0 }
 0x323   :  { %v1888_v60 = vadd.f32 %v3511_v52, %v1887_v59  ;;  %v2646_v61 = vpop.f32.mrb[154].mxu0 }
 0x324   :  { %v1899_v26 = vadd.f32 %v2646_v61, %v3511_v52  ;;  %v1890_v63 = vpop.f32.mrb[155].mxu0  ;;  %2574 = vmatpush3.bf16.xpose.msra.mxu1 %v2167_v62  ;;  %v2072_v50 = vmax.f32 %v1896_v58, 0.0 }
 0x325   :  { %v1891_v0 = vadd.f32 %v3511_v52, %v1890_v63  ;;  %v2070_v4 = vmax.f32 %v1888_v60, 0.0 }
 0x326   :  { %v2073_v1 = vmax.f32 %v1899_v26, 0.0 }
 0x327   :  { %v2071_v5 = vmax.f32 %v1891_v0, 0.0 }
 0x328   :  { %v2124_v6 = vpack.c.bf16 %v2073_v1, %v2072_v50 }
 0x329   :  { %v2123_v7 = vpack.c.bf16 %v2071_v5, %v2070_v4 }
 0x32b   :  { %2687 = vmatprep.subr.msk.bf16.mxu1 %vm2153_vm3, %v2123_v7 }
 0x32c   :  { %2576 = vmatpush3.bf16.xpose.msra.mxu1 %v2170_v8 }
 0x32d   :  { %2688 = vmatprep.subr.msk.bf16.mxu1 %vm2153_vm3, %v2124_v6 }
 0x331   :  { %v2649_v47 = vpop.f32.mrb[156].mxu0 }
 0x332   :  { %v1912_v9 = vadd.f32 %v2649_v47, %v3511_v52  ;;  %v1903_v10 = vpop.f32.mrb[157].mxu0 }
 0x333   :  { %v1904_v12 = vadd.f32 %v3511_v52, %v1903_v10  ;;  %v2650_v13 = vpop.f32.mrb[158].mxu0 }
 0x334   :  { %v1915_v15 = vadd.f32 %v2650_v13, %v3511_v52  ;;  %v1906_v41 = vpop.f32.mrb[159].mxu0  ;;  %2578 = vmatpush3.bf16.xpose.msra.mxu1 %v2173_v14  ;;  %v2076_v3 = vmax.f32 %v1912_v9, 0.0 }
 0x335   :  { %v1907_v18 = vadd.f32 %v3511_v52, %v1906_v41  ;;  %v2074_v20 = vmax.f32 %v1904_v12, 0.0 }
 0x336   :  { %v2077_v19 = vmax.f32 %v1915_v15, 0.0 }
 0x337   :  { %v2075_v21 = vmax.f32 %v1907_v18, 0.0 }
 0x338   :  { %v2126_v22 = vpack.c.bf16 %v2077_v19, %v2076_v3 }
 0x339   :  { %v2125_v23 = vpack.c.bf16 %v2075_v21, %v2074_v20 }
 0x33b   :  { %2689 = vmatprep.subr.msk.bf16.mxu1 %vm2153_vm3, %v2125_v23 }
 0x33c   :  { %2580 = vmatpush3.bf16.xpose.msra.mxu1 %v2176_v24 }
 0x33d   :  { %2690 = vmatprep.subr.msk.bf16.mxu1 %vm2153_vm3, %v2126_v22 }
 0x341   :  { %v2653_v2 = vpop.f32.mrb[160].mxu0 }
 0x342   :  { %v1928_v25 = vadd.f32 %v2653_v2, %v3511_v52  ;;  %v1919_v27 = vpop.f32.mrb[161].mxu0 }
 0x343   :  { %v1920_v29 = vadd.f32 %v3511_v52, %v1919_v27  ;;  %v2654_v30 = vpop.f32.mrb[162].mxu0 }
 0x344   :  { %2582 = vmatpush3.bf16.xpose.msra.mxu1 %v2179_v28  ;;  %v1931_v33 = vadd.f32 %v2654_v30, %v3511_v52  ;;  %v1922_v36 = vpop.f32.mrb[163].mxu0  ;;  %v2080_v17 = vmax.f32 %v1928_v25, 0.0 }
 0x345   :  { %v1923_v37 = vadd.f32 %v3511_v52, %v1922_v36  ;;  %v2078_v39 = vmax.f32 %v1920_v29, 0.0 }
 0x346   :  { %v2081_v38 = vmax.f32 %v1931_v33, 0.0 }
 0x347   :  { %v2079_v42 = vmax.f32 %v1923_v37, 0.0 }
 0x348   :  { %v3603_v43 = vpack.c.bf16 %v2081_v38, %v2080_v17 }
 0x349   :  { %v2127_v44 = vpack.c.bf16 %v2079_v42, %v2078_v39 }
 0x34b   :  { %2584 = vmatmul.mubr.msk.bf16.vlgmr.msra.gmra.mrb[128].mxu1 %vm2153_vm3, %v3559_v32  ;;  %v2206_v16 = vsel %vm2153_vm3, %v2127_v44, 0 }
 0x34c   :  { %2601 = vmatprep.mubr.msk.bf16.mxu1 %vm2153_vm3, %v3559_v32 }
 0x351   :  { %v2657_v45 = vpop.f32.mrb[164].mxu0 }
 0x352   :  { %v1944_v46 = vadd.f32 %v2657_v45, %v3511_v52  ;;  %v1935_v48 = vpop.f32.mrb[165].mxu0 }
 0x353   :  { %v1936_v49 = vadd.f32 %v3511_v52, %v1935_v48  ;;  %v2658_v40 = vpop.f32.mrb[166].mxu0 }
 0x354   :  { %v1947_v51 = vadd.f32 %v2658_v40, %v3511_v52  ;;  %v1938_v53 = vpop.f32.mrb[167].mxu0  ;;  %v2084_v55 = vmax.f32 %v1944_v46, 0.0 }
 0x355   :  { %v1939_v54 = vadd.f32 %v3511_v52, %v1938_v53  ;;  %v2082_v57 = vmax.f32 %v1936_v49, 0.0 }
 0x356   :  { %v2085_v56 = vmax.f32 %v1947_v51, 0.0  ;;  %v2209_v51 = vsel %vm2153_vm3, %v3603_v43, 0 }
 0x357   :  { %v2083_v11 = vmax.f32 %v1939_v54, 0.0 }
 0x358   :  { %v3613_v58 = vpack.c.bf16 %v2085_v56, %v2084_v55 }
 0x359   :  { %v3615_v59 = vpack.c.bf16 %v2083_v11, %v2082_v57 }
 0x361   :  { %v2661_v60 = vpop.f32.mrb[168].mxu0 }
 0x362   :  { %v1960_v61 = vadd.f32 %v2661_v60, %v3511_v52  ;;  %v1951_v62 = vpop.f32.mrb[169].mxu0 }
 0x363   :  { %v1952_v26 = vadd.f32 %v3511_v52, %v1951_v62  ;;  %v2662_v63 = vpop.f32.mrb[170].mxu0  ;;  %v2212_v62 = vsel %vm2153_vm3, %v3615_v59, 0 }
 0x364   :  { %v1963_v0 = vadd.f32 %v2662_v63, %v3511_v52  ;;  %v1954_v50 = vpop.f32.mrb[171].mxu0  ;;  %v2088_v4 = vmax.f32 %v1960_v61, 0.0 }
 0x365   :  { %v1955_v1 = vadd.f32 %v3511_v52, %v1954_v50  ;;  %v2086_v6 = vmax.f32 %v1952_v26, 0.0 }
 0x366   :  { %v2089_v5 = vmax.f32 %v1963_v0, 0.0 }
 0x367   :  { %v2087_v7 = vmax.f32 %v1955_v1, 0.0  ;;  %v2215_v1 = vsel %vm2153_vm3, %v3613_v58, 0 }
 0x368   :  { %v3621_v8 = vpack.c.bf16 %v2089_v5, %v2088_v4 }
 0x369   :  { %v3623_v47 = vpack.c.bf16 %v2087_v7, %v2086_v6 }
 0x371   :  { %v2665_v9 = vpop.f32.mrb[172].mxu0 }
 0x372   :  { %v1976_v10 = vadd.f32 %v2665_v9, %v3511_v52  ;;  %v1967_v12 = vpop.f32.mrb[173].mxu0 }
 0x373   :  { %v1968_v13 = vadd.f32 %v3511_v52, %v1967_v12  ;;  %v2666_v14 = vpop.f32.mrb[174].mxu0 }
 0x374   :  { %v1979_v15 = vadd.f32 %v2666_v14, %v3511_v52  ;;  %v1970_v41 = vpop.f32.mrb[175].mxu0  ;;  %v2092_v3 = vmax.f32 %v1976_v10, 0.0  ;;  %v2218_v14 = vsel %vm2153_vm3, %v3623_v47, 0 }
 0x375   :  { %v1971_v18 = vadd.f32 %v3511_v52, %v1970_v41  ;;  %v2090_v20 = vmax.f32 %v1968_v13, 0.0 }
 0x376   :  { %v2093_v19 = vmax.f32 %v1979_v15, 0.0 }
 0x377   :  { %v2091_v21 = vmax.f32 %v1971_v18, 0.0 }
 0x378   :  { %v3629_v22 = vpack.c.bf16 %v2093_v19, %v2092_v3  ;;  %v2221_v19 = vsel %vm2153_vm3, %v3621_v8, 0 }
 0x379   :  { %v3631_v23 = vpack.c.bf16 %v2091_v21, %v2090_v20 }
 0x37a   :  { %v2227_v8 = vsel %vm2153_vm3, %v3629_v22, 0 }
 0x381   :  { %v2669_v24 = vpop.f32.mrb[176].mxu0 }
 0x382   :  { %v1992_v2 = vadd.f32 %v2669_v24, %v3511_v52  ;;  %v1983_v25 = vpop.f32.mrb[177].mxu0 }
 0x383   :  { %v1984_v27 = vadd.f32 %v3511_v52, %v1983_v25  ;;  %v2670_v28 = vpop.f32.mrb[178].mxu0 }
 0x384   :  { %v1995_v29 = vadd.f32 %v2670_v28, %v3511_v52  ;;  %v1986_v30 = vpop.f32.mrb[179].mxu0  ;;  %v2096_v36 = vmax.f32 %v1992_v2, 0.0 }
 0x385   :  { %v1987_v33 = vadd.f32 %v3511_v52, %v1986_v30  ;;  %v2094_v17 = vmax.f32 %v1984_v27, 0.0  ;;  %v2224_v30 = vsel %vm2153_vm3, %v3631_v23, 0 }
 0x386   :  { %v2097_v37 = vmax.f32 %v1995_v29, 0.0 }
 0x387   :  { %v2095_v38 = vmax.f32 %v1987_v33, 0.0 }
 0x388   :  { %v2136_v39 = vpack.c.bf16 %v2097_v37, %v2096_v36 }
 0x389   :  { %v2135_v42 = vpack.c.bf16 %v2095_v38, %v2094_v17 }
 0x38b   :  { %2691 = vmatprep.subr.msk.bf16.mxu1 %vm2153_vm3, %v2135_v42 }
 0x38c   :  { %2586 = vmatpush3.bf16.xpose.msra.mxu1 %v2206_v16  ;;  %v2879_v16 = vmov 1966171168  }
 0x38d   :  { %2692 = vmatprep.subr.msk.bf16.mxu1 %vm2153_vm3, %v2136_v39 }
 0x391   :  { %v2673_v45 = vpop.f32.mrb[180].mxu0 }
 0x392   :  { %v2008_v46 = vadd.f32 %v2673_v45, %v3511_v52  ;;  %v1999_v48 = vpop.f32.mrb[181].mxu0  ;;  %v2342_v45 = vunpack.c.l.s4 %v2879_v16 }
 0x393   :  { %v2000_v49 = vadd.f32 %v3511_v52, %v1999_v48  ;;  %v2674_v40 = vpop.f32.mrb[182].mxu0 }
 0x394   :  { %v2011_v53 = vadd.f32 %v2674_v40, %v3511_v52  ;;  %v2002_v54 = vpop.f32.mrb[183].mxu0  ;;  %2588 = vmatpush3.bf16.xpose.msra.mxu1 %v2209_v51  ;;  %v2100_v44 = vmax.f32 %v2008_v46, 0.0  ;;  %v2343_v46 = vunpack.c.0.s8 %v2342_v45 }
 0x395   :  { %v2003_v55 = vadd.f32 %v3511_v52, %v2002_v54  ;;  %v2098_v57 = vmax.f32 %v2000_v49, 0.0 }
 0x396   :  { %v2101_v56 = vmax.f32 %v2011_v53, 0.0 }
 0x397   :  { %v2099_v11 = vmax.f32 %v2003_v55, 0.0 }
 0x398   :  { %v2138_v60 = vpack.c.bf16 %v2101_v56, %v2100_v44 }
 0x399   :  { %v2137_v61 = vpack.c.bf16 %v2099_v11, %v2098_v57 }
 0x39b   :  { %2693 = vmatprep.subr.msk.bf16.mxu1 %vm2153_vm3, %v2137_v61 }
 0x39c   :  { %2590 = vmatpush3.bf16.xpose.msra.mxu1 %v2212_v62 }
 0x39d   :  { %2694 = vmatprep.subr.msk.bf16.mxu1 %vm2153_vm3, %v2138_v60 }
 0x3a1   :  { %v2677_v43 = vpop.f32.mrb[184].mxu0 }
 0x3a2   :  { %v2024_v26 = vadd.f32 %v2677_v43, %v3511_v52  ;;  %v2015_v63 = vpop.f32.mrb[185].mxu0 }
 0x3a3   :  { %v2016_v0 = vadd.f32 %v3511_v52, %v2015_v63  ;;  %v2678_v50 = vpop.f32.mrb[186].mxu0 }
 0x3a4   :  { %v2027_v4 = vadd.f32 %v2678_v50, %v3511_v52  ;;  %v2018_v5 = vpop.f32.mrb[187].mxu0  ;;  %2592 = vmatpush3.bf16.xpose.msra.mxu1 %v2215_v1  ;;  %v2104_v59 = vmax.f32 %v2024_v26, 0.0 }
 0x3a5   :  { %v2019_v6 = vadd.f32 %v3511_v52, %v2018_v5  ;;  %v2102_v9 = vmax.f32 %v2016_v0, 0.0 }
 0x3a6   :  { %v2105_v7 = vmax.f32 %v2027_v4, 0.0 }
 0x3a7   :  { %v2103_v10 = vmax.f32 %v2019_v6, 0.0 }
 0x3a8   :  { %v2140_v12 = vpack.c.bf16 %v2105_v7, %v2104_v59 }
 0x3a9   :  { %v2139_v13 = vpack.c.bf16 %v2103_v10, %v2102_v9 }
 0x3ab   :  { %2695 = vmatprep.subr.msk.bf16.mxu1 %vm2153_vm3, %v2139_v13 }
 0x3ac   :  { %2594 = vmatpush3.bf16.xpose.msra.mxu1 %v2218_v14 }
 0x3ad   :  { %2696 = vmatprep.subr.msk.bf16.mxu1 %vm2153_vm3, %v2140_v12 }
 0x3b1   :  { %v2681_v58 = vpop.f32.mrb[188].mxu0 }
 0x3b2   :  { %v2040_v15 = vadd.f32 %v2681_v58, %v3511_v52  ;;  %v2031_v41 = vpop.f32.mrb[189].mxu0 }
 0x3b3   :  { %v2032_v18 = vadd.f32 %v3511_v52, %v2031_v41  ;;  %v2682_v3 = vpop.f32.mrb[190].mxu0 }
 0x3b4   :  { %v2043_v20 = vadd.f32 %v2682_v3, %v3511_v52  ;;  %v2034_v21 = vpop.f32.mrb[191].mxu0  ;;  %2596 = vmatpush3.bf16.xpose.msra.mxu1 %v2221_v19  ;;  %v2108_v47 = vmax.f32 %v2040_v15, 0.0 }
 0x3b5   :  { %v2035_v24 = vadd.f32 %v3511_v52, %v2034_v21  ;;  %v2106_v25 = vmax.f32 %v2032_v18, 0.0  ;;  %v2147_v52 = vpop.permute.xlu0 %2146 }
 0x3b6   :  { %v2109_v2 = vmax.f32 %v2043_v20, 0.0  ;;  %v2152_v33 = vrot.slane %v2147_v52, %v123_v35 }
 0x3b7   :  { %v2107_v27 = vmax.f32 %v2035_v24, 0.0 }
 0x3b8   :  { %v2142_v28 = vpack.c.bf16 %v2109_v2, %v2108_v47 }
 0x3b9   :  { %v2141_v29 = vpack.c.bf16 %v2107_v27, %v2106_v25 }
 0x3bb   :  { %2697 = vmatprep.subr.msk.bf16.mxu1 %vm2153_vm3, %v2141_v29 }
 0x3bc   :  { %2598 = vmatpush3.bf16.xpose.msra.mxu1 %v2224_v30 }
 0x3bd   :  { %2698 = vmatprep.subr.msk.bf16.mxu1 %vm2153_vm3, %v2142_v28 }
 0x3c4   :  { %2600 = vmatpush3.bf16.xpose.msra.mxu1 %v2227_v8 }
 0x3cb   :  { %2602 = vmatmul.mubr.msk.bf16.vlgmr.msra.gmra.mrb[132].mxu1 %vm2153_vm3, %v3559_v32  ;;  %v2346_v32 = vsub.s32 %v2343_v46, %v3242_v34 }
 0x41e   :  { %v2287_v36 = vpop.f32.mrb[128].mxu1 }
 0x41f   :  { %v2289_v37 = vpop.f32.mrb[129].mxu1  ;;  %v2288_v17 = vadd.f32 %v2287_v36, %v2152_v33 }
 0x420   :  { %v2291_v38 = vpop.f32.mrb[130].mxu1  ;;  %v2290_v39 = vadd.f32 %v2289_v37, %v2152_v33 }
 0x421   :  { %v2292_v23 = vpop.f32.mrb[131].mxu1 }
 0x422   :  { %v2339_v42 = vcombine.low %v2288_v17, %v2290_v39 }
 0x424   :  { %v2347_v55 = vrot.slane %v2339_v42, %v2346_v32 }
 0x49e   :  { %v2328_v48 = vpop.f32.mrb[132].mxu1 }
 0x49f   :  { %v2329_v22 = vadd.f32 %v2328_v48, %v2152_v33  ;;  %v2330_v49 = vpop.f32.mrb[133].mxu1 }
 0x4a0   :  { %v2331_v40 = vadd.f32 %v2330_v49, %v2152_v33  ;;  %v2332_v51 = vpop.f32.mrb[134].mxu1 }
 0x4a1   :  { %v2333_v53 = vpop.f32.mrb[135].mxu1 }
 0x4a2   :  { %v2340_v54 = vcombine.low %v2329_v22, %v2331_v40 }
 0x4a4   :  { %v2354_v35 = vrot.slane %v2340_v54, %v2346_v32 }
 0x4a6   :  { %v2355_v44 = vcombine.low %v2347_v55, %v2354_v35 }
 0x4a8   :  { %v2362_v56 = vrot.slane %v2355_v44, %v2346_v32 }
 0x4aa   :  { %2368 = vst.msk [vmem:[#allocation3] sm:$0xf] %vm2366_vm4, %v2362_v56 }
 0x4ab   :  { %2864 = shalt.err (!%p2861_p4)
}
 0x4ac   :  { %s2865_s20 = scalar_lea.hbm %s3699_s9, 64 }
 0x4ad   :  { %p2866_p5 = scmp.ne.s32.totalorder %s3699_s9, %s2865_s20  ;;  %p2869_p6 = scmp.lt.u32.totalorder %s2865_s20, %s3699_s9 }
 0x4af   :  { %p2871_p7 = pnand %p2869_p6, %p2866_p5 }
 0x4b1   :  { %2874 = shalt.err (!%p2871_p7)
}
 0x4b2   :  { %2378 = dma.vmem_to_hbm [thread:$0]  %s2376_s17, 64, %s3699_s9, [#allocation4]  }
 0x4b3   :  { %2875 = dma.done.wait [#allocation4], 64  }
 0x4b4   :  { %2876 = vsyncadd [#allocation4], 4294967232 }
 0x4b5   :  { %2382 = vsyncpa [#allocation4], 1 }

</bundles_post_ra>
